<compile_context>
chip_gen: v7x
topology: tpu7x:2x2x1
jax: 0.10.0
libtpu: 0.0.40
codegen_flags: <defaults>
</compile_context>

<pallas_src>
import numpy as np
import jax
import jax.numpy as jnp
from jax.experimental import pallas as pl
from jax.experimental.pallas import tpu as pltpu

# Small synthetic Llama config (hidden=32, 4 heads, head_dim=8, ffn=64, vocab=128).
B, S, D, H, DH, F, V = 2, 8, 32, 4, 8, 64, 128
N = B * S                      # flattened rows
EPS = 1e-5
SCALE = 1.0 / float(np.sqrt(DH))
NEG = -1e30


def _rmsnorm(x, w):
    var = jnp.mean(x * x, axis=-1, keepdims=True)
    return x * jax.lax.rsqrt(var + EPS) * w


def llama_kernel(x_ref, cos_ref, sin_ref, bias_ref,
                 attn_norm_ref, w_qkv_ref, wo_ref,
                 ffn_norm_ref, w_gu_ref, wd_ref,
                 final_norm_ref, lm_head_ref,
                 out_ref):
    bf16 = jnp.bfloat16
    f32 = jnp.float32

    x = x_ref[...]                                   # (N, D) f32, all batch rows at once
    cos = cos_ref[...]                               # (N, D)  RoPE tables (head- & batch-tiled)
    sin = sin_ref[...]                               # (N, D)
    bias = bias_ref[...]                             # (N, N)  block-diag causal additive bias

    # ---------------- attention block ----------------
    h = _rmsnorm(x, attn_norm_ref[...]).astype(bf16)
    # one fused matmul: [q*scale | k | v | rot(q)*scale | rot(k)]  -> (N, 5D) = (16, 160)
    qkv = jnp.dot(h, w_qkv_ref[...], preferred_element_type=f32)
    q = qkv[:, 0 * D:1 * D] * cos + qkv[:, 3 * D:4 * D] * sin     # RoPE = pure VPU math
    k = qkv[:, 1 * D:2 * D] * cos + qkv[:, 4 * D:5 * D] * sin
    v = qkv[:, 2 * D:3 * D]

    # head-batched attention over the flattened (B*S) row axis
    q3 = jnp.transpose(q.reshape(N, H, DH), (1, 0, 2)).astype(bf16)   # (H, N, DH)
    k3 = jnp.transpose(k.reshape(N, H, DH), (1, 0, 2)).astype(bf16)
    v3 = jnp.transpose(v.reshape(N, H, DH), (1, 0, 2)).astype(bf16)

    scores = jnp.einsum('hqd,hkd->hqk', q3, k3,
                        preferred_element_type=f32)                   # (H, N, N)
    scores = scores + bias[None, :, :]                                # mask cross-batch + future
    scores = scores - jnp.max(scores, axis=-1, keepdims=True)
    p = jnp.exp(scores)
    p = p * pl.reciprocal(jnp.sum(p, axis=-1, keepdims=True), approx=True)

    o3 = jnp.einsum('hqk,hkd->hqd', p.astype(bf16), v3,
                    preferred_element_type=f32)                       # (H, N, DH)
    attn = jnp.transpose(o3, (1, 0, 2)).reshape(N, D)
    x = x + jnp.dot(attn.astype(bf16), wo_ref[...], preferred_element_type=f32)

    # ---------------- SwiGLU MLP block ----------------
    h = _rmsnorm(x, ffn_norm_ref[...]).astype(bf16)
    gu = jnp.dot(h, w_gu_ref[...], preferred_element_type=f32)        # (N, 2F) = (16, 128)
    g = gu[:, :F]
    u = gu[:, F:]
    act = (g * jax.nn.sigmoid(g) * u).astype(bf16)                    # SiLU gate
    x = x + jnp.dot(act, wd_ref[...], preferred_element_type=f32)

    # ---------------- final norm + lm head ----------------
    h = _rmsnorm(x, final_norm_ref[...]).astype(bf16)
    out_ref[...] = jnp.dot(h, lm_head_ref[...], preferred_element_type=f32)  # (16, 128)


def llama_forward(x, kernel_args):
    """x: (B, S, D) float32 -> logits (B, S, V) float32."""
    x2 = x.reshape(N, D)
    args = (x2,) + tuple(kernel_args)

    def full_spec(a):
        nd = a.ndim
        return pl.BlockSpec(a.shape, lambda i, nd=nd: (0,) * nd)

    out = pl.pallas_call(
        llama_kernel,
        out_shape=jax.ShapeDtypeStruct((N, V), jnp.float32),
        grid_spec=pltpu.PrefetchScalarGridSpec(
            num_scalar_prefetch=0,
            grid=(1,),                 # single grid step: whole (tiny) problem at once
            in_specs=[full_spec(a) for a in args],
            out_specs=pl.BlockSpec((N, V), lambda i: (0, 0)),
        ),
        compiler_params=pltpu.CompilerParams(
            dimension_semantics=("arbitrary",),
        ),
    )(*args)
    return out.reshape(B, S, V)


# ---------------- pure-JAX f32 reference (unfused math, for correctness check) ----------------
def llama_forward_ref(x, ref_params):
    cos, sin, rrot, an, wq, wk, wv, wo, fn, wg, wu, wd, ln, lmh = [
        jnp.asarray(p, jnp.float32) for p in ref_params]
    causal = jnp.asarray(np.tril(np.ones((S, S), dtype=bool)))[None, :, :]

    def one(xb):
        h = _rmsnorm(xb, an)
        q, k, v = h @ wq, h @ wk, h @ wv
        q = q * cos + (q @ rrot) * sin
        k = k * cos + (k @ rrot) * sin
        q3 = q.reshape(S, H, DH).transpose(1, 0, 2)
        k3 = k.reshape(S, H, DH).transpose(1, 0, 2)
        v3 = v.reshape(S, H, DH).transpose(1, 0, 2)
        sc = jnp.einsum('hqd,hkd->hqk', q3, k3) * SCALE
        sc = jnp.where(causal, sc, NEG)
        p = jax.nn.softmax(sc, axis=-1)
        o3 = jnp.einsum('hqk,hkd->hqd', p, v3)
        xb = xb + o3.transpose(1, 0, 2).reshape(S, D) @ wo
        h = _rmsnorm(xb, fn)
        g, u = h @ wg, h @ wu
        xb = xb + (g * jax.nn.sigmoid(g) * u) @ wd
        return _rmsnorm(xb, ln) @ lmh

    return jax.vmap(one)(x)


def make_params(key):
    ks = jax.random.split(key, 8)
    wscale = 0.05

    # RoPE tables, tiled over heads -> lane-dense (S, D), then over batch -> (N, D)
    inv_freq = 1.0 / (10000.0 ** (np.arange(0, DH, 2, dtype=np.float32) / DH))
    ang = np.arange(S, dtype=np.float32)[:, None] * inv_freq[None, :]        # (S, DH/2)
    cos_h = np.concatenate([np.cos(ang), np.cos(ang)], axis=-1)              # (S, DH)
    sin_h = np.concatenate([np.sin(ang), np.sin(ang)], axis=-1)
    cos_sd = np.tile(cos_h, (1, H))                                          # (S, D)
    sin_sd = np.tile(sin_h, (1, H))
    cos_nd = np.tile(cos_sd, (B, 1))                                         # (N, D)
    sin_nd = np.tile(sin_sd, (B, 1))

    # rotate_half(q) = q @ rrot, block-diagonal over heads (entries in {-1,0,1})
    rr = np.zeros((DH, DH), np.float32)
    half = DH // 2
    for j in range(half):
        rr[j + half, j] = -1.0
        rr[j, j + half] = 1.0
    rrot = np.kron(np.eye(H, dtype=np.float32), rr)                          # (D, D)

    # block-diagonal (same batch element) causal additive bias over flattened rows
    bias = np.full((N, N), NEG, np.float32)
    blk = np.triu(np.full((S, S), NEG, np.float32), k=1)                     # 0 on/below diag
    for b in range(B):
        bias[b * S:(b + 1) * S, b * S:(b + 1) * S] = blk

    def w(k, shape):
        a = np.asarray(jax.random.normal(k, shape, jnp.float32)) * wscale
        # round through bf16 so kernel weights and reference weights share values
        return np.asarray(jnp.asarray(a).astype(jnp.bfloat16).astype(jnp.float32))

    wq = w(ks[0], (D, D))
    wk = w(ks[1], (D, D))
    wv = w(ks[2], (D, D))
    wo = w(ks[3], (D, D))
    wg = w(ks[4], (D, F))
    wu = w(ks[5], (D, F))
    wd = w(ks[6], (F, D))
    lmh = w(ks[7], (D, V))
    attn_norm = np.ones((1, D), np.float32)
    ffn_norm = np.ones((1, D), np.float32)
    final_norm = np.ones((1, D), np.float32)

    # ---- host-side fusions (exact up to one bf16 rounding of the *scale columns) ----
    w_qkv = np.concatenate(
        [wq * SCALE, wk, wv, (wq @ rrot) * SCALE, wk @ rrot], axis=1)        # (D, 5D)
    w_gu = np.concatenate([wg, wu], axis=1)                                  # (D, 2F)

    bf16 = jnp.bfloat16
    kernel_args = (
        jnp.asarray(cos_nd), jnp.asarray(sin_nd), jnp.asarray(bias),
        jnp.asarray(attn_norm),
        jnp.asarray(w_qkv).astype(bf16),
        jnp.asarray(wo).astype(bf16),
        jnp.asarray(ffn_norm),
        jnp.asarray(w_gu).astype(bf16),
        jnp.asarray(wd).astype(bf16),
        jnp.asarray(final_norm),
        jnp.asarray(lmh).astype(bf16),
    )
    ref_params = (
        jnp.asarray(cos_sd), jnp.asarray(sin_sd), jnp.asarray(rrot),
        jnp.asarray(attn_norm),
        jnp.asarray(wq), jnp.asarray(wk), jnp.asarray(wv), jnp.asarray(wo),
        jnp.asarray(ffn_norm),
        jnp.asarray(wg), jnp.asarray(wu), jnp.asarray(wd),
        jnp.asarray(final_norm), jnp.asarray(lmh),
    )
    return kernel_args, ref_params


if __name__ == "__main__":
    key = jax.random.PRNGKey(0)
    kx, kp = jax.random.split(key)
    x = jax.random.normal(kx, (B, S, D), jnp.float32)
    kernel_args, ref_params = make_params(kp)

    logits = jax.block_until_ready(llama_forward(x, kernel_args))
    ref = jax.block_until_ready(llama_forward_ref(x, ref_params))

    # bf16 MXU operands + approx reciprocal -> loosened tolerance vs the f32 reference.
    np.testing.assert_allclose(np.asarray(logits), np.asarray(ref),
                               rtol=2e-2, atol=2e-2)
    print("KERNEL_OK")
</pallas_src>

<mosaic_0001>
module attributes {stable_mosaic.version = 11 : i64} {
  func.func @llama_kernel(%arg0: i32, %arg1: memref<16x32xf32, #tpu.memory_space<vmem>>, %arg2: memref<16x32xf32, #tpu.memory_space<vmem>>, %arg3: memref<16x32xf32, #tpu.memory_space<vmem>>, %arg4: memref<16x16xf32, #tpu.memory_space<vmem>>, %arg5: memref<1x32xf32, #tpu.memory_space<vmem>>, %arg6: memref<32x160xbf16, #tpu.memory_space<vmem>>, %arg7: memref<32x32xbf16, #tpu.memory_space<vmem>>, %arg8: memref<1x32xf32, #tpu.memory_space<vmem>>, %arg9: memref<32x128xbf16, #tpu.memory_space<vmem>>, %arg10: memref<64x32xbf16, #tpu.memory_space<vmem>>, %arg11: memref<1x32xf32, #tpu.memory_space<vmem>>, %arg12: memref<32x128xbf16, #tpu.memory_space<vmem>>, %arg13: memref<16x128xf32, #tpu.memory_space<vmem>>) attributes {dimension_semantics = [#tpu.dimension_semantics<arbitrary>], iteration_bounds = array<i64: 1>, scalar_prefetch = 0 : i64, scratch_operands = 0 : i64, tpu.core_type = #tpu.core_type<tc>, window_params = [{pipeline_mode = #tpu.pipeline_mode<synchronous>, transform_indices = @transform_0, window_bounds = array<i64: 16, 32>}, {pipeline_mode = #tpu.pipeline_mode<synchronous>, transform_indices = @transform_1, window_bounds = array<i64: 16, 32>}, {pipeline_mode = #tpu.pipeline_mode<synchronous>, transform_indices = @transform_2, window_bounds = array<i64: 16, 32>}, {pipeline_mode = #tpu.pipeline_mode<synchronous>, transform_indices = @transform_3, window_bounds = array<i64: 16, 16>}, {pipeline_mode = #tpu.pipeline_mode<synchronous>, transform_indices = @transform_4, window_bounds = array<i64: 1, 32>}, {pipeline_mode = #tpu.pipeline_mode<synchronous>, transform_indices = @transform_5, window_bounds = array<i64: 32, 160>}, {pipeline_mode = #tpu.pipeline_mode<synchronous>, transform_indices = @transform_6, window_bounds = array<i64: 32, 32>}, {pipeline_mode = #tpu.pipeline_mode<synchronous>, transform_indices = @transform_7, window_bounds = array<i64: 1, 32>}, {pipeline_mode = #tpu.pipeline_mode<synchronous>, transform_indices = @transform_8, window_bounds = array<i64: 32, 128>}, {pipeline_mode = #tpu.pipeline_mode<synchronous>, transform_indices = @transform_9, window_bounds = array<i64: 64, 32>}, {pipeline_mode = #tpu.pipeline_mode<synchronous>, transform_indices = @transform_10, window_bounds = array<i64: 1, 32>}, {pipeline_mode = #tpu.pipeline_mode<synchronous>, transform_indices = @transform_11, window_bounds = array<i64: 32, 128>}, {pipeline_mode = #tpu.pipeline_mode<synchronous>, transform_indices = @transform_12, window_bounds = array<i64: 16, 128>}]} {
    %c0 = arith.constant 0 : index
    %c0_0 = arith.constant 0 : index
    %0 = vector.load %arg1[%c0, %c0_0] : memref<16x32xf32, #tpu.memory_space<vmem>>, vector<16x32xf32>
    %c0_1 = arith.constant 0 : index
    %c0_2 = arith.constant 0 : index
    %1 = vector.load %arg2[%c0_1, %c0_2] : memref<16x32xf32, #tpu.memory_space<vmem>>, vector<16x32xf32>
    %c0_3 = arith.constant 0 : index
    %c0_4 = arith.constant 0 : index
    %2 = vector.load %arg3[%c0_3, %c0_4] : memref<16x32xf32, #tpu.memory_space<vmem>>, vector<16x32xf32>
    %c0_5 = arith.constant 0 : index
    %c0_6 = arith.constant 0 : index
    %3 = vector.load %arg4[%c0_5, %c0_6] : memref<16x16xf32, #tpu.memory_space<vmem>>, vector<16x16xf32>
    %c0_7 = arith.constant 0 : index
    %c0_8 = arith.constant 0 : index
    %4 = vector.load %arg5[%c0_7, %c0_8] : memref<1x32xf32, #tpu.memory_space<vmem>>, vector<1x32xf32>
    %5 = arith.mulf %0, %0 : vector<16x32xf32>
    %cst = arith.constant dense<0.000000e+00> : vector<16xf32>
    %6 = vector.multi_reduction <add>, %5, %cst [1] : vector<16x32xf32> to vector<16xf32>
    %7 = vector.shape_cast %6 : vector<16xf32> to vector<16x1xf32>
    %cst_9 = arith.constant 3.200000e+01 : f32
    %8 = vector.broadcast %cst_9 : f32 to vector<16x1xf32>
    %9 = arith.divf %7, %8 : vector<16x1xf32>
    %cst_10 = arith.constant 9.99999974E-6 : f32
    %10 = vector.broadcast %cst_10 : f32 to vector<16x1xf32>
    %11 = arith.addf %9, %10 : vector<16x1xf32>
    %12 = math.rsqrt %11 : vector<16x1xf32>
    %13 = vector.broadcast %12 : vector<16x1xf32> to vector<16x32xf32>
    %14 = arith.mulf %0, %13 : vector<16x32xf32>
    %15 = vector.broadcast %4 : vector<1x32xf32> to vector<16x32xf32>
    %16 = arith.mulf %14, %15 : vector<16x32xf32>
    %17 = arith.truncf %16 : vector<16x32xf32> to vector<16x32xbf16>
    %c0_11 = arith.constant 0 : index
    %c0_12 = arith.constant 0 : index
    %18 = vector.load %arg6[%c0_11, %c0_12] : memref<32x160xbf16, #tpu.memory_space<vmem>>, vector<32x160xbf16>
    %cst_13 = arith.constant dense<0.000000e+00> : vector<16x160xf32>
    %19 = tpu.matmul %17, %18, %cst_13 {dimension_numbers = #tpu.dot_dimension_numbers<[1], [0], [0], [1], [0, 0, 1, 1], [], []>} : vector<16x32xbf16>, vector<32x160xbf16>, vector<16x160xf32> -> vector<16x160xf32>
    %20 = vector.extract_strided_slice %19 {offsets = [0, 0], sizes = [16, 32], strides = [1, 1]} : vector<16x160xf32> to vector<16x32xf32>
    %21 = arith.mulf %20, %1 : vector<16x32xf32>
    %22 = vector.extract_strided_slice %19 {offsets = [0, 96], sizes = [16, 32], strides = [1, 1]} : vector<16x160xf32> to vector<16x32xf32>
    %23 = arith.mulf %22, %2 : vector<16x32xf32>
    %24 = arith.addf %21, %23 : vector<16x32xf32>
    %25 = vector.extract_strided_slice %19 {offsets = [0, 32], sizes = [16, 32], strides = [1, 1]} : vector<16x160xf32> to vector<16x32xf32>
    %26 = arith.mulf %25, %1 : vector<16x32xf32>
    %27 = vector.extract_strided_slice %19 {offsets = [0, 128], sizes = [16, 32], strides = [1, 1]} : vector<16x160xf32> to vector<16x32xf32>
    %28 = arith.mulf %27, %2 : vector<16x32xf32>
    %29 = arith.addf %26, %28 : vector<16x32xf32>
    %30 = vector.extract_strided_slice %19 {offsets = [0, 64], sizes = [16, 32], strides = [1, 1]} : vector<16x160xf32> to vector<16x32xf32>
    %31 = vector.shape_cast %24 : vector<16x32xf32> to vector<16x4x8xf32>
    %32 = tpu.transpose %31, [1, 0, 2] : vector<16x4x8xf32> -> vector<4x16x8xf32>
    %33 = arith.truncf %32 : vector<4x16x8xf32> to vector<4x16x8xbf16>
    %34 = vector.shape_cast %29 : vector<16x32xf32> to vector<16x4x8xf32>
    %35 = tpu.transpose %34, [1, 0, 2] : vector<16x4x8xf32> -> vector<4x16x8xf32>
    %36 = arith.truncf %35 : vector<4x16x8xf32> to vector<4x16x8xbf16>
    %37 = vector.shape_cast %30 : vector<16x32xf32> to vector<16x4x8xf32>
    %38 = tpu.transpose %37, [1, 0, 2] : vector<16x4x8xf32> -> vector<4x16x8xf32>
    %39 = arith.truncf %38 : vector<4x16x8xf32> to vector<4x16x8xbf16>
    "tpu.trace_start"() <{level = 10 : i32, message = "hqd,hkd->hqk"}> : () -> ()
    %cst_14 = arith.constant dense<0.000000e+00> : vector<4x16x16xf32>
    %40 = tpu.matmul %33, %36, %cst_14 {dimension_numbers = #tpu.dot_dimension_numbers<[2], [2], [1], [1], [0, 0, 0, 1, 1, 1], [0], [0]>} : vector<4x16x8xbf16>, vector<4x16x8xbf16>, vector<4x16x16xf32> -> vector<4x16x16xf32>
    "tpu.trace_stop"() : () -> ()
    %41 = vector.shape_cast %3 : vector<16x16xf32> to vector<1x16x16xf32>
    %42 = vector.broadcast %41 : vector<1x16x16xf32> to vector<4x16x16xf32>
    %43 = arith.addf %40, %42 : vector<4x16x16xf32>
    %cst_15 = arith.constant dense<0xFF800000> : vector<4x16xf32>
    %44 = vector.multi_reduction <maximumf>, %43, %cst_15 [2] : vector<4x16x16xf32> to vector<4x16xf32>
    %45 = vector.shape_cast %44 : vector<4x16xf32> to vector<4x16x1xf32>
    %46 = vector.broadcast %45 : vector<4x16x1xf32> to vector<4x16x16xf32>
    %47 = arith.subf %43, %46 : vector<4x16x16xf32>
    %48 = math.exp %47 : vector<4x16x16xf32>
    %cst_16 = arith.constant dense<0.000000e+00> : vector<4x16xf32>
    %49 = vector.multi_reduction <add>, %48, %cst_16 [2] : vector<4x16x16xf32> to vector<4x16xf32>
    %50 = vector.shape_cast %49 : vector<4x16xf32> to vector<4x16x1xf32>
    %51 = tpu.reciprocal %50 {approx = true} : vector<4x16x1xf32> -> vector<4x16x1xf32>
    %52 = vector.broadcast %51 : vector<4x16x1xf32> to vector<4x16x16xf32>
    %53 = arith.mulf %48, %52 : vector<4x16x16xf32>
    %54 = arith.truncf %53 : vector<4x16x16xf32> to vector<4x16x16xbf16>
    "tpu.trace_start"() <{level = 10 : i32, message = "hqk,hkd->hqd"}> : () -> ()
    %cst_17 = arith.constant dense<0.000000e+00> : vector<4x16x8xf32>
    %55 = tpu.matmul %54, %39, %cst_17 {dimension_numbers = #tpu.dot_dimension_numbers<[2], [1], [1], [2], [0, 0, 0, 1, 1, 2], [0], [0]>} : vector<4x16x16xbf16>, vector<4x16x8xbf16>, vector<4x16x8xf32> -> vector<4x16x8xf32>
    "tpu.trace_stop"() : () -> ()
    %56 = tpu.transpose %55, [1, 0, 2] : vector<4x16x8xf32> -> vector<16x4x8xf32>
    %57 = vector.shape_cast %56 : vector<16x4x8xf32> to vector<16x32xf32>
    %58 = arith.truncf %57 : vector<16x32xf32> to vector<16x32xbf16>
    %c0_18 = arith.constant 0 : index
    %c0_19 = arith.constant 0 : index
    %59 = vector.load %arg7[%c0_18, %c0_19] : memref<32x32xbf16, #tpu.memory_space<vmem>>, vector<32x32xbf16>
    %cst_20 = arith.constant dense<0.000000e+00> : vector<16x32xf32>
    %60 = tpu.matmul %58, %59, %cst_20 {dimension_numbers = #tpu.dot_dimension_numbers<[1], [0], [0], [1], [0, 0, 1, 1], [], []>} : vector<16x32xbf16>, vector<32x32xbf16>, vector<16x32xf32> -> vector<16x32xf32>
    %61 = arith.addf %0, %60 : vector<16x32xf32>
    %c0_21 = arith.constant 0 : index
    %c0_22 = arith.constant 0 : index
    %62 = vector.load %arg8[%c0_21, %c0_22] : memref<1x32xf32, #tpu.memory_space<vmem>>, vector<1x32xf32>
    %63 = arith.mulf %61, %61 : vector<16x32xf32>
    %cst_23 = arith.constant dense<0.000000e+00> : vector<16xf32>
    %64 = vector.multi_reduction <add>, %63, %cst_23 [1] : vector<16x32xf32> to vector<16xf32>
    %65 = vector.shape_cast %64 : vector<16xf32> to vector<16x1xf32>
    %cst_24 = arith.constant 3.200000e+01 : f32
    %66 = vector.broadcast %cst_24 : f32 to vector<16x1xf32>
    %67 = arith.divf %65, %66 : vector<16x1xf32>
    %cst_25 = arith.constant 9.99999974E-6 : f32
    %68 = vector.broadcast %cst_25 : f32 to vector<16x1xf32>
    %69 = arith.addf %67, %68 : vector<16x1xf32>
    %70 = math.rsqrt %69 : vector<16x1xf32>
    %71 = vector.broadcast %70 : vector<16x1xf32> to vector<16x32xf32>
    %72 = arith.mulf %61, %71 : vector<16x32xf32>
    %73 = vector.broadcast %62 : vector<1x32xf32> to vector<16x32xf32>
    %74 = arith.mulf %72, %73 : vector<16x32xf32>
    %75 = arith.truncf %74 : vector<16x32xf32> to vector<16x32xbf16>
    %c0_26 = arith.constant 0 : index
    %c0_27 = arith.constant 0 : index
    %76 = vector.load %arg9[%c0_26, %c0_27] : memref<32x128xbf16, #tpu.memory_space<vmem>>, vector<32x128xbf16>
    %cst_28 = arith.constant dense<0.000000e+00> : vector<16x128xf32>
    %77 = tpu.matmul %75, %76, %cst_28 {dimension_numbers = #tpu.dot_dimension_numbers<[1], [0], [0], [1], [0, 0, 1, 1], [], []>} : vector<16x32xbf16>, vector<32x128xbf16>, vector<16x128xf32> -> vector<16x128xf32>
    %78 = vector.extract_strided_slice %77 {offsets = [0, 0], sizes = [16, 64], strides = [1, 1]} : vector<16x128xf32> to vector<16x64xf32>
    %79 = vector.extract_strided_slice %77 {offsets = [0, 64], sizes = [16, 64], strides = [1, 1]} : vector<16x128xf32> to vector<16x64xf32>
    %80 = arith.negf %78 : vector<16x64xf32>
    %81 = math.exp %80 : vector<16x64xf32>
    %cst_29 = arith.constant 1.000000e+00 : f32
    %82 = vector.broadcast %cst_29 : f32 to vector<16x64xf32>
    %83 = arith.addf %82, %81 : vector<16x64xf32>
    %84 = arith.divf %82, %83 : vector<16x64xf32>
    %85 = arith.mulf %78, %84 : vector<16x64xf32>
    %86 = arith.mulf %85, %79 : vector<16x64xf32>
    %87 = arith.truncf %86 : vector<16x64xf32> to vector<16x64xbf16>
    %c0_30 = arith.constant 0 : index
    %c0_31 = arith.constant 0 : index
    %88 = vector.load %arg10[%c0_30, %c0_31] : memref<64x32xbf16, #tpu.memory_space<vmem>>, vector<64x32xbf16>
    %cst_32 = arith.constant dense<0.000000e+00> : vector<16x32xf32>
    %89 = tpu.matmul %87, %88, %cst_32 {dimension_numbers = #tpu.dot_dimension_numbers<[1], [0], [0], [1], [0, 0, 1, 1], [], []>} : vector<16x64xbf16>, vector<64x32xbf16>, vector<16x32xf32> -> vector<16x32xf32>
    %90 = arith.addf %61, %89 : vector<16x32xf32>
    %c0_33 = arith.constant 0 : index
    %c0_34 = arith.constant 0 : index
    %91 = vector.load %arg11[%c0_33, %c0_34] : memref<1x32xf32, #tpu.memory_space<vmem>>, vector<1x32xf32>
    %92 = arith.mulf %90, %90 : vector<16x32xf32>
    %cst_35 = arith.constant dense<0.000000e+00> : vector<16xf32>
    %93 = vector.multi_reduction <add>, %92, %cst_35 [1] : vector<16x32xf32> to vector<16xf32>
    %94 = vector.shape_cast %93 : vector<16xf32> to vector<16x1xf32>
    %cst_36 = arith.constant 3.200000e+01 : f32
    %95 = vector.broadcast %cst_36 : f32 to vector<16x1xf32>
    %96 = arith.divf %94, %95 : vector<16x1xf32>
    %cst_37 = arith.constant 9.99999974E-6 : f32
    %97 = vector.broadcast %cst_37 : f32 to vector<16x1xf32>
    %98 = arith.addf %96, %97 : vector<16x1xf32>
    %99 = math.rsqrt %98 : vector<16x1xf32>
    %100 = vector.broadcast %99 : vector<16x1xf32> to vector<16x32xf32>
    %101 = arith.mulf %90, %100 : vector<16x32xf32>
    %102 = vector.broadcast %91 : vector<1x32xf32> to vector<16x32xf32>
    %103 = arith.mulf %101, %102 : vector<16x32xf32>
    %104 = arith.truncf %103 : vector<16x32xf32> to vector<16x32xbf16>
    %c0_38 = arith.constant 0 : index
    %c0_39 = arith.constant 0 : index
    %105 = vector.load %arg12[%c0_38, %c0_39] : memref<32x128xbf16, #tpu.memory_space<vmem>>, vector<32x128xbf16>
    %cst_40 = arith.constant dense<0.000000e+00> : vector<16x128xf32>
    %106 = tpu.matmul %104, %105, %cst_40 {dimension_numbers = #tpu.dot_dimension_numbers<[1], [0], [0], [1], [0, 0, 1, 1], [], []>} : vector<16x32xbf16>, vector<32x128xbf16>, vector<16x128xf32> -> vector<16x128xf32>
    %c0_41 = arith.constant 0 : index
    %c0_42 = arith.constant 0 : index
    %107 = vector.load %arg13[%c0_41, %c0_42] : memref<16x128xf32, #tpu.memory_space<vmem>>, vector<16x128xf32>
    tpu.vector_store %arg13[%c0_41, %c0_42], %106 {strides = array<i32>} : memref<16x128xf32, #tpu.memory_space<vmem>>, vector<16x128xf32>,
    return
  }
  func.func @transform_0(%arg0: i32) -> (i32, i32) {
    %c0_i32 = arith.constant 0 : i32
    %c0_i32_0 = arith.constant 0 : i32
    %c0_i32_1 = arith.constant 0 : i32
    return %c0_i32, %c0_i32_0 : i32, i32
  }
  func.func @transform_1(%arg0: i32) -> (i32, i32) {
    %c0_i32 = arith.constant 0 : i32
    %c0_i32_0 = arith.constant 0 : i32
    %c0_i32_1 = arith.constant 0 : i32
    return %c0_i32, %c0_i32_0 : i32, i32
  }
  func.func @transform_2(%arg0: i32) -> (i32, i32) {
    %c0_i32 = arith.constant 0 : i32
    %c0_i32_0 = arith.constant 0 : i32
    %c0_i32_1 = arith.constant 0 : i32
    return %c0_i32, %c0_i32_0 : i32, i32
  }
  func.func @transform_3(%arg0: i32) -> (i32, i32) {
    %c0_i32 = arith.constant 0 : i32
    %c0_i32_0 = arith.constant 0 : i32
    %c0_i32_1 = arith.constant 0 : i32
    return %c0_i32, %c0_i32_0 : i32, i32
  }
  func.func @transform_4(%arg0: i32) -> (i32, i32) {
    %c0_i32 = arith.constant 0 : i32
    %c0_i32_0 = arith.constant 0 : i32
    %c0_i32_1 = arith.constant 0 : i32
    return %c0_i32, %c0_i32_0 : i32, i32
  }
  func.func @transform_5(%arg0: i32) -> (i32, i32) {
    %c0_i32 = arith.constant 0 : i32
    %c0_i32_0 = arith.constant 0 : i32
    %c0_i32_1 = arith.constant 0 : i32
    return %c0_i32, %c0_i32_0 : i32, i32
  }
  func.func @transform_6(%arg0: i32) -> (i32, i32) {
    %c0_i32 = arith.constant 0 : i32
    %c0_i32_0 = arith.constant 0 : i32
    %c0_i32_1 = arith.constant 0 : i32
    return %c0_i32, %c0_i32_0 : i32, i32
  }
  func.func @transform_7(%arg0: i32) -> (i32, i32) {
    %c0_i32 = arith.constant 0 : i32
    %c0_i32_0 = arith.constant 0 : i32
    %c0_i32_1 = arith.constant 0 : i32
    return %c0_i32, %c0_i32_0 : i32, i32
  }
  func.func @transform_8(%arg0: i32) -> (i32, i32) {
    %c0_i32 = arith.constant 0 : i32
    %c0_i32_0 = arith.constant 0 : i32
    %c0_i32_1 = arith.constant 0 : i32
    return %c0_i32, %c0_i32_0 : i32, i32
  }
  func.func @transform_9(%arg0: i32) -> (i32, i32) {
    %c0_i32 = arith.constant 0 : i32
    %c0_i32_0 = arith.constant 0 : i32
    %c0_i32_1 = arith.constant 0 : i32
    return %c0_i32, %c0_i32_0 : i32, i32
  }
  func.func @transform_10(%arg0: i32) -> (i32, i32) {
    %c0_i32 = arith.constant 0 : i32
    %c0_i32_0 = arith.constant 0 : i32
    %c0_i32_1 = arith.constant 0 : i32
    return %c0_i32, %c0_i32_0 : i32, i32
  }
  func.func @transform_11(%arg0: i32) -> (i32, i32) {
    %c0_i32 = arith.constant 0 : i32
    %c0_i32_0 = arith.constant 0 : i32
    %c0_i32_1 = arith.constant 0 : i32
    return %c0_i32, %c0_i32_0 : i32, i32
  }
  func.func @transform_12(%arg0: i32) -> (i32, i32) {
    %c0_i32 = arith.constant 0 : i32
    %c0_i32_0 = arith.constant 0 : i32
    %c0_i32_1 = arith.constant 0 : i32
    return %c0_i32, %c0_i32_0 : i32, i32
  }
}

</mosaic_0001>

<bundles_post_ra>
// kernel: tpu_custom_call.1
= control target key start
LH: loop header
LB: loop body
LE: loop exit
PB: predicated region body
PF: predicated region fallthrough
CT: control target
= control target key end

     0   :  { %17 = vsyncpa [#allocation3], 0  ;;  %s3361_s0 = inlined_call_operand.vmem [shape: f32[16,32], index: 0, kind: input, shape index: {}]   ;;  %s3362_s1 = inlined_call_operand.hbm [shape: f32[16,32], index: 1, kind: input, shape index: {}]   ;;  %s3363_s2 = inlined_call_operand.hbm [shape: f32[16,32], index: 2, kind: input, shape index: {}]   ;;  %s3364_s3 = inlined_call_operand.hbm [shape: f32[16,16], index: 3, kind: input, shape index: {}]   ;;  %s3365_s4 = inlined_call_operand.vmem [shape: f32[1,32], index: 4, kind: input, shape index: {}]   ;;  %s3366_s5 = inlined_call_operand.vmem [shape: bf16[32,160], index: 5, kind: input, shape index: {}]   ;;  %s3367_s6 = inlined_call_operand.hbm [shape: bf16[32,32], index: 6, kind: input, shape index: {}]   ;;  %s3368_s7 = inlined_call_operand.vmem [shape: f32[1,32], index: 7, kind: input, shape index: {}]   ;;  %s3369_s8 = inlined_call_operand.hbm [shape: bf16[32,128], index: 8, kind: input, shape index: {}]   ;;  %s3370_s9 = inlined_call_operand.vmem [shape: bf16[64,32], index: 9, kind: input, shape index: {}]   ;;  %s3371_s10 = inlined_call_operand.vmem [shape: f32[1,32], index: 10, kind: input, shape index: {}]   ;;  %s3372_s11 = inlined_call_operand.vmem [shape: bf16[32,128], index: 11, kind: input, shape index: {}]   ;;  %s3373_s12 = inlined_call_operand.hbm [shape: f32[16,128], index: 12, kind: output, shape index: {}]  }
   0x1   :  { %18 = vsyncpa [#allocation6], 0 }
   0x2   :  { %19 = vsyncpa [#allocation9], 0 }
   0x3   :  { %20 = vsyncpa [#allocation4], 0  ;;  %s2715_s21 = smov [#allocation5]   ;;  %s2716_s23 = smov [#allocation8]  }
   0x4   :  { %s40_s22 = sshll.u32 %s2715_s21, 4  ;;  %s68_s24 = sshll.u32 %s2716_s23, 4  ;;  %s41_s22 = int_to_ptr.vmem [resolvable:$true] %s40_s22  ;;  %s2802_s24 = int_to_ptr.vmem [resolvable:$true] %s68_s24 }
   0x5   :  { %s2575_s27 = scalar_lea.hbm %s3363_s2, 256 }
   0x6   :  { %p2576_p0 = scmp.ne.s32.totalorder %s3363_s2, %s2575_s27  ;;  %p2579_p1 = scmp.lt.u32.totalorder %s2575_s27, %s3363_s2 }
   0x8   :  { %p2581_p2 = pnand %p2579_p1, %p2576_p0 }
   0xa   :  { %2584 = shalt.err (!%p2581_p2)
}
   0xb   :  { %s2585_s14 = scalar_lea.vmem %s41_s22, 256  ;;  %p2590_p4 = scmp.lt.s32.totalorder %s41_s22, %s41_s22 }
   0xc   :  { %p2586_p3 = scmp.ne.s32.totalorder %s41_s22, %s2585_s14  ;;  %p2591_p5 = scmp.lt.s32.totalorder %s2585_s14, %s2585_s14 }
   0xe   :  { %p2592_p6 = por %p2591_p5, %p2590_p4 }
  0x10   :  { %p2593_p7 = pnand %p2592_p6, %p2586_p3 }
  0x12   :  { %2596 = shalt.err (!%p2593_p7)
}
  0x13   :  { %s2717_s15 = smov 128   ;;  %s2718_s16 = smov 8  }
  0x14   :  { %46 = dma.hbm_to_vmem [thread:$0]  %s3363_s2, 256, %s41_s22, [#allocation6], %s2717_s15, %s2717_s15, %s2718_s16  }
  0x15   :  { %s2597_s21 = scalar_lea.hbm %s3367_s6, 256 }
  0x16   :  { %p2598_p8 = scmp.ne.s32.totalorder %s3367_s6, %s2597_s21  ;;  %p2601_p9 = scmp.lt.u32.totalorder %s2597_s21, %s3367_s6 }
  0x18   :  { %p2603_p10 = pnand %p2601_p9, %p2598_p8 }
  0x1a   :  { %2606 = shalt.err (!%p2603_p10)
}
  0x1b   :  { %s2607_s28 = scalar_lea.vmem %s2802_s24, 256  ;;  %p2612_p12 = scmp.lt.s32.totalorder %s2802_s24, %s2802_s24 }
  0x1c   :  { %p2608_p11 = scmp.ne.s32.totalorder %s2802_s24, %s2607_s28  ;;  %p2613_p13 = scmp.lt.s32.totalorder %s2607_s28, %s2607_s28 }
  0x1e   :  { %p2614_p0 = por %p2613_p13, %p2612_p12 }
  0x20   :  { %p2615_p1 = pnand %p2614_p0, %p2608_p11 }
  0x22   :  { %2618 = shalt.err (!%p2615_p1)
}
  0x23   :  { %s2719_s2 = smov 64   ;;  %s2720_s22 = smov 4  }
  0x24   :  { %74 = dma.hbm_to_vmem [thread:$0]  %s3367_s6, 256, %s2802_s24, [#allocation9], %s2719_s2, %s2719_s2, %s2720_s22  }
  0x25   :  { %s2721_s13 = smov [#allocation2]   ;;  %s2722_s17 = smov [#allocation7]  }
  0x26   :  { %s28_s14 = sshll.u32 %s2721_s13, 4  ;;  %s52_s18 = sshll.u32 %s2722_s17, 4  ;;  %s29_s14 = int_to_ptr.vmem [resolvable:$true] %s28_s14  ;;  %s2839_s18 = int_to_ptr.vmem [resolvable:$true] %s52_s18 }
  0x27   :  { %s2619_s21 = scalar_lea.hbm %s3362_s1, 256 }
  0x28   :  { %p2620_p2 = scmp.ne.s32.totalorder %s3362_s1, %s2619_s21  ;;  %p2623_p3 = scmp.lt.u32.totalorder %s2619_s21, %s3362_s1 }
  0x2a   :  { %p2625_p4 = pnand %p2623_p3, %p2620_p2 }
  0x2c   :  { %2628 = shalt.err (!%p2625_p4)
}
  0x2d   :  { %s2629_s6 = scalar_lea.vmem %s29_s14, 256  ;;  %p2634_p6 = scmp.lt.s32.totalorder %s29_s14, %s29_s14 }
  0x2e   :  { %p2630_p5 = scmp.ne.s32.totalorder %s29_s14, %s2629_s6  ;;  %p2635_p7 = scmp.lt.s32.totalorder %s2629_s6, %s2629_s6 }
  0x30   :  { %p2636_p8 = por %p2635_p7, %p2634_p6 }
  0x32   :  { %p2637_p9 = pnand %p2636_p8, %p2630_p5 }
  0x34   :  { %2640 = shalt.err (!%p2637_p9)
}
  0x35   :  { %34 = dma.hbm_to_vmem [thread:$0]  %s3362_s1, 256, %s29_s14, [#allocation3], %s2717_s15, %s2717_s15, %s2718_s16  }
  0x36   :  { %s2641_s13 = scalar_lea.hbm %s3364_s3, 256 }
  0x37   :  { %p2642_p10 = scmp.ne.s32.totalorder %s3364_s3, %s2641_s13  ;;  %p2645_p11 = scmp.lt.u32.totalorder %s2641_s13, %s3364_s3 }
  0x39   :  { %p2647_p12 = pnand %p2645_p11, %p2642_p10 }
  0x3b   :  { %2650 = shalt.err (!%p2647_p12)
}
  0x3c   :  { %s2651_s23 = scalar_lea.vmem %s2839_s18, 256  ;;  %p2656_p0 = scmp.lt.s32.totalorder %s2839_s18, %s2839_s18 }
  0x3d   :  { %p2652_p13 = scmp.ne.s32.totalorder %s2839_s18, %s2651_s23  ;;  %p2657_p1 = scmp.lt.s32.totalorder %s2651_s23, %s2651_s23 }
  0x3f   :  { %p2658_p2 = por %p2657_p1, %p2656_p0 }
  0x41   :  { %p2659_p3 = pnand %p2658_p2, %p2652_p13 }
  0x43   :  { %2662 = shalt.err (!%p2659_p3)
}
  0x44   :  { %58 = dma.hbm_to_vmem [thread:$0]  %s3364_s3, 256, %s2839_s18, [#allocation6], %s2717_s15, %s2717_s15, %s2718_s16  }
  0x45   :  { %s2723_s25 = smov [#allocation10]   ;;  %s2663_s24 = scalar_lea.hbm %s3369_s8, 256 }
  0x46   :  { %s82_s26 = sshll.u32 %s2723_s25, 4  ;;  %p2664_p4 = scmp.ne.s32.totalorder %s3369_s8, %s2663_s24  ;;  %s83_s26 = int_to_ptr.vmem [resolvable:$true] %s82_s26 }
  0x47   :  { %p2667_p5 = scmp.lt.u32.totalorder %s2663_s24, %s3369_s8 }
  0x49   :  { %p2669_p6 = pnand %p2667_p5, %p2664_p4 }
  0x4b   :  { %2672 = shalt.err (!%p2669_p6)
}
  0x4c   :  { %s2673_s17 = scalar_lea.vmem %s83_s26, 256  ;;  %p2678_p8 = scmp.lt.s32.totalorder %s83_s26, %s83_s26 }
  0x4d   :  { %p2674_p7 = scmp.ne.s32.totalorder %s83_s26, %s2673_s17  ;;  %p2679_p9 = scmp.lt.s32.totalorder %s2673_s17, %s2673_s17 }
  0x4f   :  { %p2680_p10 = por %p2679_p9, %p2678_p8 }
  0x51   :  { %p2681_p11 = pnand %p2680_p10, %p2674_p7 }
  0x53   :  { %2684 = shalt.err (!%p2681_p11)
}
  0x54   :  { %88 = dma.hbm_to_vmem [thread:$0]  %s3369_s8, 256, %s83_s26, [#allocation9], %s2719_s2, %s2719_s2, %s2720_s22  }
  0x55   :  { %2707 = dma.done.wait [#allocation3], 256  }
  0x56   :  { %2708 = vsyncadd [#allocation3], 4294967040 }
  0x57   :  { %2709 = dma.done.wait [#allocation6], 512  }
  0x58   :  { %2710 = vsyncadd [#allocation6], 4294966784 }
  0x59   :  { %2711 = dma.done.wait [#allocation9], 512  }
  0x5a   :  { %2712 = vsyncadd [#allocation9], 4294966784  ;;  %v111_v0 = vld [vmem:[%s3361_s0] sm:$0xff]  ;;  %vm122_vm0 = vcmask 261120   ;;  %v112_v1 = vld [vmem:[%s3361_s0 + $0x8] sm:$0xff]  ;;  %v2724_v9 = vmov 0  }
  0x5b   :  { %v120_v2 = vmul.f32 %v111_v0, %v111_v0  ;;  %v121_v3 = vmul.f32 %v112_v1, %v112_v1  ;;  %v2505_v6 = vld [vmem:[%s3366_s5 + $0x4] ss:$8 sps:$4 sm:$0xff]   ;;  %v2507_v7 = vld [vmem:[%s3366_s5] ss:$8 sps:$4 sm:$0xff]   ;;  %v2508_v8 = vld [vmem:[%s3366_s5 + $0x14] ss:$8 sps:$4 sm:$0xff]   ;;  %206 = vmatprep.mubr.bf16.mxu0 %v2724_v9 }
  0x5c   :  { %174 = vmatprep.subr.bf16.mxu0 %v2505_v6  ;;  %v2510_v10 = vld [vmem:[%s3366_s5 + $0x10] ss:$8 sps:$4 sm:$0xff]   ;;  %v2911_v11 = vld [vmem:[#allocation2] sm:$0xff]  ;;  %s2725_s24 = smov 32   ;;  %v114_v12 = vld [vmem:[#allocation2 + $0x8] sm:$0xff]  ;;  %s2727_s29 = smov 120  }
  0x5d   :  { %v123_v4 = vsel %vm122_vm0, %v120_v2, 0.0  ;;  %v126_v5 = vsel %vm122_vm0, %v121_v3, 0.0  ;;  %175 = vmatpush1.bf16.msra.mxu0 %v2507_v7  ;;  %241 = vrot.lane.b32.xlu1 %v2911_v11, %s2725_s24  ;;  %v2306_v22 = vld [vmem:[%s3365_s4] ss:$0 sm:$0xff]  ;;  %v115_v27 = vld [vmem:[#allocation5] sm:$0xff]  ;;  %v116_v30 = vld [vmem:[#allocation5 + $0x8] sm:$0xff]  ;;  %v286_v2 = vlaneseq }
  0x5e   :  { %124 = vadd.xlane.f32.xlu0 %v123_v4  ;;  %176 = vmatprep.subr.bf16.mxu0 %v2508_v8  ;;  %s2726_s4 = smov 96   ;;  %s2728_s30 = smov 112   ;;  %v2730_v59 = vmov 0.0   ;;  %vm2731_vm1 = vmmov 0   ;;  %v2733_v7 = vmov 1934713408  }
  0x5f   :  { %s2729_s13 = smov 104   ;;  %2384 = vmatprep.subr.bf16.mxu1 %v2730_v59  ;;  %2386 = vmatprep.mubr.msk.bf16.mxu1 %vm2731_vm1, %v2730_v59  ;;  %v287_v6 = vshrl.u32 %v286_v2, 7  ;;  %v316_v8 = vunpack.c.l.s4 %v2733_v7  ;;  %vm1185_vm2 = vcmask 64512   ;;  %vm1374_vm3 = vcmask 130048   ;;  %s2734_s17 = smov 16  }
  0x60   :  { %s2735_s3 = smov 24   ;;  %vm1943_vm4 = vcmask 195584   ;;  %vm2152_vm5 = vcmask 523264  }
  0x61   :  { %177 = vmatpush1.bf16.msra.mxu0 %v2510_v10  ;;  %243 = vrot.lane.b32.xlu1 %v114_v12, %s2725_s24 }
  0x62   :  { %127 = vadd.xlane.f32.xlu0 %v126_v5  ;;  %2390 = vmatprep.subr.bf16.mxu0 %v2730_v59 }
  0xcf   :  { %v242_v35 = vpop.permute.xlu1 %241 }
  0xd3   :  { %v244_v36 = vpop.permute.xlu1 %243 }
  0xeb   :  { %v125_v13 = vpop.xlane.xlu0 %124 }
  0xec   :  { %v130_v14 = vmul.f32 0.03125, %v125_v13 }
  0xee   :  { %v132_v15 = vadd.f32 1e-05, %v130_v14  ;;  %v317_v14 = vunpack.c.0.s8 %v316_v8 }
  0xef   :  { %v128_v16 = vpop.xlane.xlu0 %127 }
  0xf0   :  { %2521 = vrsqrt.f32 %v132_v15  ;;  %v131_v17 = vmul.f32 0.03125, %v128_v16 }
  0xf2   :  { %v133_v18 = vadd.f32 1e-05, %v131_v17 }
  0xf4   :  { %2523 = vrsqrt.f32 %v133_v18 }
  0xfa   :  { %v2522_v19 = vpop.eup %2521 }
  0xfb   :  { %v136_v20 = vmul.f32 %v2522_v19, %v111_v0  ;;  %v2732_v0 = vmov 1983009808  }
  0xfd   :  { %v144_v24 = vmul.f32 %v2306_v22, %v136_v20 }
  0xfe   :  { %v2524_v21 = vpop.eup %2523 }
  0xff   :  { %v137_v23 = vmul.f32 %v2524_v21, %v112_v1  ;;  %v284_v1 = vunpack.c.l.s4 %v2732_v0 }
 0x101   :  { %v145_v25 = vmul.f32 %v2306_v22, %v137_v23  ;;  %v285_v5 = vunpack.c.0.s8 %v284_v1  ;;  %v2989_v22 = vsub.s32 %v317_v14, %v287_v6 }
 0x103   :  { %v146_v26 = vpack.c.bf16 %v145_v25, %v144_v24  ;;  %v2985_v10 = vsub.s32 %v285_v5, %v287_v6 }
 0x105   :  { %2311 = vmatmul.mubr.msk.bf16.vlgmr.msra.gmra.mrb[0].mxu0 %vm122_vm0, %v146_v26 }
 0x106   :  { %2392 = vmatprep.mubr.msk.bf16.mxu0 %vm2731_vm1, %v2730_v59 }
 0x1d8   :  { %v2920_v28 = vpop.f32.mrb[0].mxu0 }
 0x1d9   :  { %v210_v29 = vpop.f32.mrb[1].mxu0  ;;  %v247_v37 = vmul.f32 %v242_v35, %v2920_v28  ;;  %v217_v56 = vmul.f32 %v2920_v28, %v2911_v11 }
 0x1da   :  { %v249_v31 = vmul.f32 %v210_v29, %v115_v27  ;;  %v2922_v32 = vpop.f32.mrb[2].mxu0 }
 0x1db   :  { %v214_v33 = vpop.f32.mrb[3].mxu0  ;;  %v248_v40 = vmul.f32 %v244_v36, %v2922_v32  ;;  %v218_v52 = vmul.f32 %v2922_v32, %v114_v12 }
 0x1dc   :  { %v250_v34 = vmul.f32 %v214_v33, %v116_v30  ;;  %253 = vrot.lane.b32.xlu0 %v249_v31, %s2725_s24 }
 0x1de   :  { %255 = vrot.lane.b32.xlu1 %v250_v34, %s2725_s24 }
 0x1e2   :  { %221 = vrot.lane.b32.xlu1 %v115_v27, %s2726_s4 }
 0x1e6   :  { %223 = vrot.lane.b32.xlu1 %v116_v30, %s2726_s4 }
 0x24e   :  { %v254_v38 = vpop.permute.xlu0 %253 }
 0x24f   :  { %v259_v39 = vadd.f32 %v254_v38, %v247_v37 }
 0x250   :  { %v256_v41 = vpop.permute.xlu1 %255 }
 0x251   :  { %v260_v42 = vadd.f32 %v256_v41, %v248_v40  ;;  %559 = vrot.lane.b32.xlu1 %v259_v39, %s2727_s29 }
 0x253   :  { %565 = vrot.lane.b32.xlu0 %v260_v42, %s2728_s30 }
 0x254   :  { %v222_v43 = vpop.permute.xlu1 %221 }
 0x255   :  { %563 = vrot.lane.b32.xlu1 %v259_v39, %s2728_s30  ;;  %v227_v46 = vmul.f32 %v222_v43, %v2920_v28 }
 0x257   :  { %569 = vrot.lane.b32.xlu0 %v260_v42, %s2729_s13 }
 0x258   :  { %v224_v44 = vpop.permute.xlu1 %223 }
 0x259   :  { %v228_v45 = vmul.f32 %v224_v44, %v2922_v32  ;;  %561 = vrot.lane.b32.xlu1 %v260_v42, %s2727_s29 }
 0x25b   :  { %233 = vrot.lane.b32.xlu0 %v228_v45, %s2725_s24 }
 0x25d   :  { %567 = vrot.lane.b32.xlu1 %v259_v39, %s2729_s13 }
 0x261   :  { %231 = vrot.lane.b32.xlu1 %v227_v46, %s2725_s24 }
 0x265   :  { %571 = vrot.lane.b32.xlu1 %v259_v39, %s2726_s4 }
 0x2c3   :  { %v560_v47 = vpop.permute.xlu1 %559 }
 0x2c5   :  { %v566_v48 = vpop.permute.xlu0 %565 }
 0x2c7   :  { %v564_v49 = vpop.permute.xlu1 %563 }
 0x2c9   :  { %v570_v50 = vpop.permute.xlu0 %569 }
 0x2cb   :  { %v562_v51 = vpop.permute.xlu1 %561 }
 0x2cd   :  { %v234_v53 = vpop.permute.xlu0 %233 }
 0x2ce   :  { %v2942_v54 = vadd.f32 %v234_v53, %v218_v52 }
 0x2cf   :  { %v568_v55 = vpop.permute.xlu1 %567 }
 0x2d0   :  { %265 = vrot.lane.b32.xlu0 %v2942_v54, %s2727_s29 }
 0x2d3   :  { %v232_v57 = vpop.permute.xlu1 %231 }
 0x2d4   :  { %v2948_v58 = vadd.f32 %v232_v57, %v217_v56  ;;  %573 = vrot.lane.b32.xlu0 %v260_v42, %s2726_s4 }
 0x2d6   :  { %263 = vrot.lane.b32.xlu1 %v2948_v58, %s2727_s29 }
 0x2d7   :  { %v572_v61 = vpop.permute.xlu1 %571 }
 0x2d8   :  { %577 = vrot.lane.b32.xlu0 %v562_v51, %s2726_s4 }
 0x2da   :  { %575 = vrot.lane.b32.xlu1 %v560_v47, %s2726_s4 }
 0x2dc   :  { %581 = vrot.lane.b32.xlu0 %v566_v48, %s2726_s4 }
 0x2de   :  { %579 = vrot.lane.b32.xlu1 %v564_v49, %s2726_s4 }
 0x2e0   :  { %585 = vrot.lane.b32.xlu0 %v570_v50, %s2726_s4 }
 0x2e2   :  { %583 = vrot.lane.b32.xlu1 %v568_v55, %s2726_s4 }
 0x2e4   :  { %271 = vrot.lane.b32.xlu0 %v2942_v54, %s2728_s30 }
 0x2e6   :  { %269 = vrot.lane.b32.xlu1 %v2948_v58, %s2728_s30 }
 0x2e8   :  { %277 = vrot.lane.b32.xlu0 %v2942_v54, %s2729_s13 }
 0x2ea   :  { %275 = vrot.lane.b32.xlu1 %v2948_v58, %s2729_s13 }
 0x2ec   :  { %873 = vrot.lane.b32.xlu0 %v2920_v28, %s2727_s29 }
 0x2ee   :  { %875 = vrot.lane.b32.xlu1 %v2922_v32, %s2727_s29 }
 0x2f0   :  { %879 = vrot.lane.b32.xlu0 %v2922_v32, %s2728_s30 }
 0x2f2   :  { %877 = vrot.lane.b32.xlu1 %v2920_v28, %s2728_s30 }
 0x342   :  { %v2981_v60 = vpop.permute.xlu0 %265 }
 0x346   :  { %v574_v62 = vpop.permute.xlu0 %573 }
 0x348   :  { %v2983_v63 = vpop.permute.xlu1 %263 }
 0x34a   :  { %v578_v3 = vpop.permute.xlu0 %577 }
 0x34c   :  { %v576_v4 = vpop.permute.xlu1 %575 }
 0x34e   :  { %v582_v9 = vpop.permute.xlu0 %581 }
 0x34f   :  { %v663_v11 = vcombine.low %v574_v62, %v582_v9  ;;  %v664_v12 = vcombine.high %v574_v62, %v582_v9 }
 0x350   :  { %v580_v13 = vpop.permute.xlu1 %579 }
 0x351   :  { %v595_v15 = vcombine.low %v572_v61, %v580_v13  ;;  %v671_v19 = vrot.slane %v663_v11, %v2985_v10  ;;  %v678_v20 = vrot.slane %v664_v12, %v2985_v10  ;;  %v596_v21 = vcombine.high %v572_v61, %v580_v13 }
 0x352   :  { %v586_v16 = vpop.permute.xlu0 %585 }
 0x353   :  { %v679_v17 = vcombine.low %v578_v3, %v586_v16  ;;  %v680_v18 = vcombine.high %v578_v3, %v586_v16  ;;  %v603_v29 = vrot.slane %v595_v15, %v2985_v10  ;;  %v610_v36 = vrot.slane %v596_v21, %v2985_v10 }
 0x354   :  { %v584_v23 = vpop.permute.xlu1 %583 }
 0x355   :  { %v687_v24 = vrot.slane %v679_v17, %v2985_v10  ;;  %v694_v25 = vrot.slane %v680_v18, %v2985_v10  ;;  %v611_v26 = vcombine.low %v576_v4, %v584_v23  ;;  %v612_v27 = vcombine.high %v576_v4, %v584_v23 }
 0x356   :  { %v272_v30 = vpop.permute.xlu0 %271 }
 0x357   :  { %v695_v31 = vcombine.low %v671_v19, %v687_v24  ;;  %v696_v33 = vcombine.high %v671_v19, %v687_v24  ;;  %v711_v34 = vcombine.low %v678_v20, %v694_v25  ;;  %v712_v35 = vcombine.high %v678_v20, %v694_v25 }
 0x358   :  { %v619_v37 = vrot.slane %v611_v26, %v2985_v10  ;;  %v626_v38 = vrot.slane %v612_v27, %v2985_v10  ;;  %v349_v39 = vcombine.low %v2942_v54, %v272_v30  ;;  %v270_v40 = vpop.permute.xlu1 %269  ;;  %v350_v51 = vcombine.high %v2942_v54, %v272_v30 }
 0x359   :  { %v2999_v41 = vrot.slane %v695_v31, %v2989_v22  ;;  %v3002_v42 = vrot.slane %v696_v33, %v2989_v22  ;;  %v3005_v43 = vrot.slane %v711_v34, %v2989_v22  ;;  %v3008_v44 = vrot.slane %v712_v35, %v2989_v22 }
 0x35a   :  { %v627_v45 = vcombine.low %v603_v29, %v619_v37  ;;  %v628_v46 = vcombine.high %v603_v29, %v619_v37  ;;  %v643_v47 = vcombine.low %v610_v36, %v626_v38  ;;  %v644_v48 = vcombine.high %v610_v36, %v626_v38  ;;  %v278_v57 = vpop.permute.xlu0 %277 }
 0x35b   :  { %v799_v49 = vcombine.low %v2999_v41, %v3002_v42  ;;  %v2318_v50 = vcombine.high %v2999_v41, %v3002_v42  ;;  %v815_v61 = vcombine.low %v3005_v43, %v3008_v44  ;;  %v357_v62 = vrot.slane %v349_v39, %v2985_v10 }
 0x35c   :  { %v635_v52 = vrot.slane %v627_v45, %v2989_v22  ;;  %v642_v53 = vrot.slane %v628_v46, %v2989_v22  ;;  %v651_v55 = vrot.slane %v643_v47, %v2989_v22  ;;  %v658_v56 = vrot.slane %v644_v48, %v2989_v22  ;;  %v276_v2 = vpop.permute.xlu1 %275 }
 0x35d   :  { %v281_v0 = vcombine.low %v2948_v58, %v270_v40  ;;  %v282_v1 = vcombine.high %v2948_v58, %v270_v40  ;;  %v364_v6 = vrot.slane %v350_v51, %v2985_v10  ;;  %v365_v8 = vcombine.low %v2981_v60, %v278_v57 }
 0x35e   :  { %v731_v54 = vcombine.low %v635_v52, %v642_v53  ;;  %v2316_v3 = vcombine.high %v635_v52, %v642_v53  ;;  %v747_v4 = vcombine.low %v651_v55, %v658_v56  ;;  %v2317_v5 = vcombine.high %v651_v55, %v658_v56 }
 0x35f   :  { %v289_v7 = vrot.slane %v281_v0, %v2985_v10  ;;  %v366_v9 = vcombine.high %v2981_v60, %v278_v57  ;;  %v297_v11 = vcombine.low %v2983_v63, %v276_v2  ;;  %v298_v12 = vcombine.high %v2983_v63, %v276_v2 }
 0x360   :  { %v3031_v13 = vrot.slane %v731_v54, %v2985_v10  ;;  %v3034_v58 = vrot.slane %v2316_v3, %v2985_v10  ;;  %v296_v14 = vrot.slane %v282_v1, %v2985_v10  ;;  %v373_v15 = vrot.slane %v365_v8, %v2985_v10 }
 0x361   :  { %v380_v16 = vrot.slane %v366_v9, %v2985_v10  ;;  %v3040_v17 = vrot.slane %v747_v4, %v2985_v10  ;;  %v305_v60 = vrot.slane %v297_v11, %v2985_v10  ;;  %v312_v18 = vrot.slane %v298_v12, %v2985_v10 }
 0x362   :  { %v3045_v63 = vrot.slane %v2317_v5, %v2985_v10  ;;  %v763_v19 = vcombine.low %v3031_v13, %v3034_v58  ;;  %v381_v20 = vcombine.low %v357_v62, %v373_v15  ;;  %v382_v21 = vcombine.high %v357_v62, %v373_v15 }
 0x363   :  { %v397_v23 = vcombine.low %v364_v6, %v380_v16  ;;  %v398_v24 = vcombine.high %v364_v6, %v380_v16  ;;  %v313_v25 = vcombine.low %v289_v7, %v305_v60  ;;  %v314_v26 = vcombine.high %v289_v7, %v305_v60 }
 0x364   :  { %v329_v27 = vcombine.low %v296_v14, %v312_v18  ;;  %v330_v29 = vcombine.high %v296_v14, %v312_v18  ;;  %v389_v30 = vrot.slane %v381_v20, %v2989_v22  ;;  %v396_v31 = vrot.slane %v382_v21, %v2989_v22 }
 0x365   :  { %v405_v33 = vrot.slane %v397_v23, %v2989_v22  ;;  %v412_v34 = vrot.slane %v398_v24, %v2989_v22  ;;  %v321_v35 = vrot.slane %v313_v25, %v2989_v22  ;;  %v328_v36 = vrot.slane %v314_v26, %v2989_v22 }
 0x366   :  { %v337_v37 = vrot.slane %v329_v27, %v2989_v22  ;;  %v344_v38 = vrot.slane %v330_v29, %v2989_v22  ;;  %v485_v39 = vcombine.low %v389_v30, %v396_v31  ;;  %v2314_v40 = vcombine.high %v389_v30, %v396_v31 }
 0x367   :  { %v501_v45 = vcombine.low %v405_v33, %v412_v34  ;;  %v2315_v46 = vcombine.high %v405_v33, %v412_v34  ;;  %v417_v47 = vcombine.low %v321_v35, %v328_v36  ;;  %v2312_v48 = vcombine.high %v321_v35, %v328_v36 }
 0x368   :  { %v433_v51 = vcombine.low %v337_v37, %v344_v38  ;;  %v2313_v52 = vcombine.high %v337_v37, %v344_v38  ;;  %v2319_v53 = vcombine.high %v3005_v43, %v3008_v44  ;;  %v806_v55 = vrot.slane %v799_v49, %v2985_v10 }
 0x369   :  { %v3061_v56 = vrot.slane %v485_v39, %v2985_v10  ;;  %v3064_v57 = vrot.slane %v2314_v40, %v2985_v10  ;;  %v424_v62 = vrot.slane %v417_v47, %v2985_v10  ;;  %v432_v0 = vrot.slane %v2312_v48, %v2985_v10 }
 0x36a   :  { %v3069_v1 = vrot.slane %v501_v45, %v2985_v10  ;;  %v440_v2 = vrot.slane %v433_v51, %v2985_v10  ;;  %v448_v54 = vrot.slane %v2313_v52, %v2985_v10  ;;  %v779_v43 = vcombine.low %v3040_v17, %v3045_v63 }
 0x36b   :  { %v516_v44 = vrot.slane %v2315_v46, %v2985_v10  ;;  %v771_v49 = vrot.slane %v763_v19, %v2989_v22  ;;  %v814_v3 = vrot.slane %v2318_v50, %v2985_v10  ;;  %v822_v4 = vrot.slane %v815_v61, %v2985_v10 }
 0x36c   :  { %v787_v5 = vrot.slane %v779_v43, %v2989_v22  ;;  %v830_v6 = vrot.slane %v2319_v53, %v2985_v10  ;;  %v449_v8 = vcombine.low %v424_v62, %v432_v0  ;;  %v465_v11 = vcombine.low %v440_v2, %v448_v54 }
 0x36d   :  { %v831_v7 = vcombine.low %v806_v55, %v814_v3  ;;  %v517_v15 = vcombine.low %v3061_v56, %v3064_v57  ;;  %v533_v16 = vcombine.low %v3069_v1, %v516_v44  ;;  %v764_v50 = vcombine.high %v3031_v13, %v3034_v58 }
 0x36e   :  { %v847_v9 = vcombine.low %v822_v4, %v830_v6  ;;  %v795_v12 = vcombine.low %v771_v49, %v787_v5  ;;  %v796_v42 = vcombine.high %v771_v49, %v787_v5  ;;  %v780_v61 = vcombine.high %v3040_v17, %v3045_v63 }
 0x36f   :  { %v839_v14 = vrot.slane %v831_v7, %v2989_v22  ;;  %v457_v60 = vrot.slane %v449_v8, %v2989_v22  ;;  %v473_v18 = vrot.slane %v465_v11, %v2989_v22  ;;  %v832_v19 = vcombine.high %v806_v55, %v814_v3  ;;  %v118_v7 = vld [vmem:[#allocation7 + $0x8] sm:$0xff] }
 0x370   :  { %v855_v41 = vrot.slane %v847_v9, %v2989_v22  ;;  %v848_v20 = vcombine.high %v822_v4, %v830_v6  ;;  %v525_v24 = vrot.slane %v517_v15, %v2989_v22  ;;  %v541_v25 = vrot.slane %v533_v16, %v2989_v22  ;;  %v117_v4 = vld [vmem:[#allocation7] sm:$0xff] }
 0x371   :  { %v778_v26 = vrot.slane %v764_v50, %v2989_v22  ;;  %v794_v13 = vrot.slane %v780_v61, %v2989_v22  ;;  %v846_v17 = vrot.slane %v832_v19, %v2989_v22  ;;  %v481_v29 = vcombine.low %v457_v60, %v473_v18 }
 0x372   :  { %v863_v21 = vcombine.low %v839_v14, %v855_v41  ;;  %v864_v23 = vcombine.high %v839_v14, %v855_v41  ;;  %v862_v63 = vrot.slane %v848_v20, %v2989_v22  ;;  %v482_v30 = vcombine.high %v457_v60, %v473_v18 }
 0x373   :  { %v797_v34 = vcombine.low %v778_v26, %v794_v13  ;;  %v798_v35 = vcombine.high %v778_v26, %v794_v13  ;;  %v450_v36 = vcombine.high %v424_v62, %v432_v0  ;;  %v466_v37 = vcombine.high %v440_v2, %v448_v54 }
 0x374   :  { %v867_v58 = vpack.c.bf16 %v863_v21, %v795_v12  ;;  %v868_v27 = vpack.c.bf16 %v864_v23, %v796_v42  ;;  %v549_v38 = vcombine.low %v525_v24, %v541_v25  ;;  %v550_v39 = vcombine.high %v525_v24, %v541_v25 }
 0x375   :  { %v865_v40 = vcombine.low %v846_v17, %v862_v63  ;;  %v866_v45 = vcombine.high %v846_v17, %v862_v63  ;;  %v518_v46 = vcombine.high %v3061_v56, %v3064_v57  ;;  %v534_v47 = vcombine.high %v3069_v1, %v516_v44 }
 0x376   :  { %v1190_v31 = vsel %vm1185_vm2, %v867_v58, 0  ;;  %v1237_v33 = vsel %vm1185_vm2, %v868_v27, 0  ;;  %v553_v48 = vpack.c.bf16 %v549_v38, %v481_v29  ;;  %v554_v51 = vpack.c.bf16 %v550_v39, %v482_v30 }
 0x377   :  { %2385 = vmatpush3.bf16.xpose.msra.mxu1 %v1190_v31  ;;  %2391 = vmatpush3.bf16.xpose.msra.mxu0 %v1237_v33  ;;  %v869_v52 = vpack.c.bf16 %v865_v40, %v797_v34  ;;  %v870_v53 = vpack.c.bf16 %v866_v45, %v798_v35  ;;  %v464_v55 = vrot.slane %v450_v36, %v2989_v22  ;;  %v876_v35 = vpop.permute.xlu1 %875  ;;  %v874_v36 = vpop.permute.xlu0 %873 }
 0x378   :  { %2396 = vmatprep.subr.bf16.mxu1 %v2730_v59  ;;  %2402 = vmatprep.subr.bf16.mxu0 %v2730_v59  ;;  %v480_v62 = vrot.slane %v466_v37, %v2989_v22  ;;  %v532_v0 = vrot.slane %v518_v46, %v2989_v22  ;;  %v548_v2 = vrot.slane %v534_v47, %v2989_v22 }
 0x379   :  { %v1284_v56 = vsel %vm1185_vm2, %v869_v52, 0  ;;  %v1331_v57 = vsel %vm1185_vm2, %v870_v53, 0 }
 0x37a   :  { %v483_v1 = vcombine.low %v464_v55, %v480_v62  ;;  %v484_v54 = vcombine.high %v464_v55, %v480_v62  ;;  %v551_v43 = vcombine.low %v532_v0, %v548_v2  ;;  %v552_v44 = vcombine.high %v532_v0, %v548_v2 }
 0x37b   :  { %v878_v37 = vpop.permute.xlu1 %877  ;;  %v880_v38 = vpop.permute.xlu0 %879 }
 0x37c   :  { %v555_v49 = vpack.c.bf16 %v551_v43, %v483_v1  ;;  %v556_v3 = vpack.c.bf16 %v552_v44, %v484_v54 }
 0x37e   :  { %2387 = vmatmul.mubr.msk.bf16.vlgmr.msra.gmra.mrb[0].mxu1 %vm1185_vm2, %v553_v48  ;;  %2393 = vmatmul.mubr.msk.bf16.vlgmr.msra.gmra.mrb[4].mxu0 %vm1185_vm2, %v554_v51 }
 0x37f   :  { %2397 = vmatpush3.bf16.xpose.msra.mxu1 %v1284_v56  ;;  %2403 = vmatpush3.bf16.xpose.msra.mxu0 %v1331_v57 }
 0x380   :  { %2398 = vmatprep.mubr.msk.bf16.mxu1 %vm2731_vm1, %v2730_v59  ;;  %2404 = vmatprep.mubr.msk.bf16.mxu0 %vm2731_vm1, %v2730_v59 }
 0x381   :  { %2408 = vmatprep.subr.bf16.mxu1 %v2730_v59  ;;  %2414 = vmatprep.subr.bf16.mxu0 %v2730_v59 }
 0x386   :  { %2399 = vmatmul.mubr.msk.bf16.vlgmr.msra.gmra.mrb[4].mxu1 %vm1185_vm2, %v555_v49  ;;  %2405 = vmatmul.mubr.msk.bf16.vlgmr.msra.gmra.mrb[8].mxu0 %vm1185_vm2, %v556_v3 }
 0x387   :  { %2410 = vmatprep.mubr.msk.bf16.mxu1 %vm2731_vm1, %v2730_v59  ;;  %2416 = vmatprep.mubr.msk.bf16.mxu0 %vm2731_vm1, %v2730_v59 }
 0x451   :  { %v1226_v5 = vpop.f32.mrb[0].mxu1  ;;  %v1273_v6 = vpop.f32.mrb[4].mxu0 }
 0x452   :  { %v3128_v8 = vadd.f32 %v1226_v5, %v117_v4  ;;  %v1274_v9 = vadd.f32 %v1273_v6, %v117_v4  ;;  %v2388_v11 = vpop.f32.mrb[1].mxu1  ;;  %v2394_v12 = vpop.f32.mrb[5].mxu0 }
 0x453   :  { %v1229_v14 = vpop.f32.mrb[2].mxu1  ;;  %v1276_v15 = vpop.f32.mrb[6].mxu0 }
 0x454   :  { %v1230_v16 = vadd.f32 %v1229_v14, %v118_v7  ;;  %v3130_v41 = vadd.f32 %v1276_v15, %v118_v7  ;;  %v2389_v42 = vpop.f32.mrb[3].mxu1  ;;  %v2395_v50 = vpop.f32.mrb[7].mxu0  ;;  %v1381_v61 = vsel %vm1374_vm3, %v1274_v9, -inf  ;;  %v1375_v60 = vsel %vm1374_vm3, %v3128_v8, -inf }
 0x455   :  { %1382 = vmax.xlane.f32.xlu0 %v1381_v61  ;;  %1376 = vmax.xlane.f32.xlu1 %v1375_v60 }
 0x456   :  { %v1384_v18 = vsel %vm1374_vm3, %v3130_v41, -inf  ;;  %v1378_v19 = vsel %vm1374_vm3, %v1230_v16, -inf }
 0x459   :  { %v1367_v20 = vpop.f32.mrb[8].mxu0  ;;  %1385 = vmax.xlane.f32.xlu1 %v1384_v18  ;;  %1379 = vmax.xlane.f32.xlu0 %v1378_v19  ;;  %v1320_v21 = vpop.f32.mrb[4].mxu1 }
 0x45a   :  { %v1321_v23 = vadd.f32 %v1320_v21, %v117_v4  ;;  %v2400_v24 = vpop.f32.mrb[5].mxu1  ;;  %v2406_v25 = vpop.f32.mrb[9].mxu0  ;;  %v1368_v58 = vadd.f32 %v1367_v20, %v117_v4 }
 0x45b   :  { %v1323_v26 = vpop.f32.mrb[6].mxu1  ;;  %v1370_v13 = vpop.f32.mrb[10].mxu0 }
 0x45c   :  { %v1324_v27 = vadd.f32 %v1323_v26, %v118_v7  ;;  %v2401_v17 = vpop.f32.mrb[7].mxu1  ;;  %v2407_v63 = vpop.f32.mrb[11].mxu0  ;;  %v1387_v29 = vsel %vm1374_vm3, %v1321_v23, -inf  ;;  %v1371_v30 = vadd.f32 %v1370_v13, %v118_v7  ;;  %v1393_v33 = vsel %vm1374_vm3, %v1368_v58, -inf }
 0x45d   :  { %1388 = vmax.xlane.f32.xlu0 %v1387_v29 }
 0x45e   :  { %v1390_v31 = vsel %vm1374_vm3, %v1324_v27, -inf  ;;  %v1396_v34 = vsel %vm1374_vm3, %v1371_v30, -inf }
 0x45f   :  { %1391 = vmax.xlane.f32.xlu1 %v1390_v31 }
 0x461   :  { %1394 = vmax.xlane.f32.xlu0 %v1393_v33 }
 0x463   :  { %1397 = vmax.xlane.f32.xlu1 %v1396_v34 }
 0x474   :  { %881 = vrot.lane.b32.xlu1 %v2920_v28, %s2729_s13 }
 0x477   :  { %883 = vrot.lane.b32.xlu0 %v2922_v32, %s2729_s13 }
 0x478   :  { %887 = vrot.lane.b32.xlu1 %v2922_v32, %s2719_s2 }
 0x47b   :  { %885 = vrot.lane.b32.xlu0 %v2920_v28, %s2719_s2 }
 0x47c   :  { %889 = vrot.lane.b32.xlu1 %v874_v36, %s2719_s2 }
 0x47f   :  { %891 = vrot.lane.b32.xlu0 %v876_v35, %s2719_s2 }
 0x480   :  { %893 = vrot.lane.b32.xlu1 %v878_v37, %s2719_s2 }
 0x483   :  { %895 = vrot.lane.b32.xlu0 %v880_v38, %s2719_s2 }
 0x4e2   :  { %v1383_v39 = vpop.xlane.xlu0 %1382  ;;  %v1377_v40 = vpop.xlane.xlu1 %1376 }
 0x4e3   :  { %v1401_v53 = vsub.f32 %v1274_v9, %v1383_v39  ;;  %v1399_v0 = vsub.f32 %v3128_v8, %v1377_v40 }
 0x4e5   :  { %v1411_v55 = vmul.f32 1.442695, %v1401_v53  ;;  %v1407_v57 = vmul.f32 1.442695, %v1399_v0 }
 0x4e6   :  { %v1380_v45 = vpop.xlane.xlu0 %1379  ;;  %v1386_v46 = vpop.xlane.xlu1 %1385 }
 0x4e7   :  { %v1400_v62 = vsub.f32 %v1230_v16, %v1380_v45  ;;  %2525 = vpow2.f32 %v1411_v55  ;;  %v1402_v1 = vsub.f32 %v3130_v41, %v1386_v46 }
 0x4e9   :  { %v1409_v2 = vmul.f32 1.442695, %v1400_v62  ;;  %v1413_v44 = vmul.f32 1.442695, %v1402_v1 }
 0x4ea   :  { %v1389_v32 = vpop.xlane.xlu0 %1388 }
 0x4eb   :  { %2527 = vpow2.f32 %v1409_v2  ;;  %v1403_v49 = vsub.f32 %v1321_v23, %v1389_v32 }
 0x4ec   :  { %v1392_v47 = vpop.xlane.xlu1 %1391  ;;  %2529 = vpow2.f32 %v1407_v57 }
 0x4ed   :  { %v1404_v56 = vsub.f32 %v1324_v27, %v1392_v47  ;;  %v1415_v5 = vmul.f32 1.442695, %v1403_v49 }
 0x4ee   :  { %v1395_v48 = vpop.xlane.xlu0 %1394 }
 0x4ef   :  { %v1417_v54 = vmul.f32 1.442695, %v1404_v56  ;;  %v1405_v43 = vsub.f32 %v1368_v58, %v1395_v48 }
 0x4f0   :  { %v1398_v51 = vpop.xlane.xlu1 %1397 }
 0x4f1   :  { %2531 = vpow2.f32 %v1417_v54  ;;  %v1419_v3 = vmul.f32 1.442695, %v1405_v43  ;;  %v3158_v4 = vpop.eup %2525  ;;  %v1406_v6 = vsub.f32 %v1371_v30, %v1398_v51 }
 0x4f2   :  { %v884_v52 = vpop.permute.xlu0 %883  ;;  %2533 = vpow2.f32 %v1413_v44  ;;  %v1429_v7 = vsel %vm1374_vm3, %v3158_v4, 0.0 }
 0x4f3   :  { %899 = vrot.lane.b32.xlu0 %v884_v52, %s2719_s2  ;;  %2535 = vpow2.f32 %v1419_v3  ;;  %v1421_v9 = vmul.f32 1.442695, %v1406_v6 }
 0x4f4   :  { %v882_v28 = vpop.permute.xlu1 %881  ;;  %2537 = vpow2.f32 %v1415_v5 }
 0x4f5   :  { %897 = vrot.lane.b32.xlu1 %v882_v28, %s2719_s2  ;;  %v3162_v8 = vpop.eup %2527  ;;  %2539 = vpow2.f32 %v1421_v9 }
 0x4f6   :  { %v3164_v11 = vpop.eup %2529  ;;  %v1426_v12 = vsel %vm1374_vm3, %v3162_v8, 0.0  ;;  %v886_v21 = vpop.permute.xlu0 %885 }
 0x4f7   :  { %v1423_v15 = vsel %vm1374_vm3, %v3164_v11, 0.0 }
 0x4f8   :  { %v888_v23 = vpop.permute.xlu1 %887 }
 0x4fa   :  { %v892_v24 = vpop.permute.xlu0 %891 }
 0x4fb   :  { %v3168_v14 = vpop.eup %2531 }
 0x4fc   :  { %v3172_v16 = vpop.eup %2533  ;;  %v1438_v41 = vsel %vm1374_vm3, %v3168_v14, 0.0  ;;  %v890_v25 = vpop.permute.xlu1 %889 }
 0x4fd   :  { %v3176_v42 = vpop.eup %2535  ;;  %v1432_v50 = vsel %vm1374_vm3, %v3172_v16, 0.0 }
 0x4fe   :  { %v3180_v61 = vpop.eup %2537  ;;  %v1441_v60 = vsel %vm1374_vm3, %v3176_v42, 0.0  ;;  %v896_v26 = vpop.permute.xlu0 %895 }
 0x4ff   :  { %v1435_v18 = vsel %vm1374_vm3, %v3180_v61, 0.0  ;;  %v3186_v19 = vpop.eup %2539  ;;  %v977_v13 = vcombine.low %v888_v23, %v896_v26  ;;  %v978_v58 = vcombine.high %v888_v23, %v896_v26 }
 0x500   :  { %v1444_v20 = vsel %vm1374_vm3, %v3186_v19, 0.0  ;;  %v894_v27 = vpop.permute.xlu1 %893 }
 0x501   :  { %v985_v30 = vrot.slane %v977_v13, %v2985_v10  ;;  %v992_v31 = vrot.slane %v978_v58, %v2985_v10  ;;  %v909_v33 = vcombine.low %v886_v21, %v894_v27  ;;  %v910_v34 = vcombine.high %v886_v21, %v894_v27 }
 0x503   :  { %v917_v47 = vrot.slane %v909_v33, %v2985_v10  ;;  %v924_v48 = vrot.slane %v910_v34, %v2985_v10 }
 0x512   :  { %1430 = vadd.xlane.f32.xlu0 %v1429_v7 }
 0x516   :  { %1427 = vadd.xlane.f32.xlu0 %v1426_v12 }
 0x519   :  { %1424 = vadd.xlane.f32.xlu1 %v1423_v15 }
 0x51a   :  { %1439 = vadd.xlane.f32.xlu0 %v1438_v41 }
 0x51d   :  { %1433 = vadd.xlane.f32.xlu1 %v1432_v50 }
 0x51e   :  { %1442 = vadd.xlane.f32.xlu0 %v1441_v60 }
 0x521   :  { %1436 = vadd.xlane.f32.xlu1 %v1435_v18 }
 0x525   :  { %1445 = vadd.xlane.f32.xlu1 %v1444_v20 }
 0x565   :  { %v900_v17 = vpop.permute.xlu0 %899 }
 0x566   :  { %v993_v63 = vcombine.low %v892_v24, %v900_v17  ;;  %v994_v29 = vcombine.high %v892_v24, %v900_v17 }
 0x567   :  { %v898_v35 = vpop.permute.xlu1 %897 }
 0x568   :  { %v1001_v36 = vrot.slane %v993_v63, %v2985_v10  ;;  %v1008_v37 = vrot.slane %v994_v29, %v2985_v10  ;;  %v925_v38 = vcombine.low %v890_v25, %v898_v35  ;;  %v926_v39 = vcombine.high %v890_v25, %v898_v35 }
 0x56a   :  { %v1009_v40 = vcombine.low %v985_v30, %v1001_v36  ;;  %v1010_v45 = vcombine.high %v985_v30, %v1001_v36  ;;  %v1025_v46 = vcombine.low %v992_v31, %v1008_v37  ;;  %v1026_v32 = vcombine.high %v992_v31, %v1008_v37 }
 0x56b   :  { %v933_v51 = vrot.slane %v925_v38, %v2985_v10  ;;  %v940_v52 = vrot.slane %v926_v39, %v2985_v10 }
 0x56c   :  { %v1017_v28 = vrot.slane %v1009_v40, %v2989_v22  ;;  %v1024_v53 = vrot.slane %v1010_v45, %v2989_v22  ;;  %v1033_v55 = vrot.slane %v1025_v46, %v2989_v22  ;;  %v1040_v62 = vrot.slane %v1026_v32, %v2989_v22 }
 0x56d   :  { %v941_v0 = vcombine.low %v917_v47, %v933_v51  ;;  %v942_v2 = vcombine.high %v917_v47, %v933_v51  ;;  %v957_v56 = vcombine.low %v924_v48, %v940_v52  ;;  %v958_v57 = vcombine.high %v924_v48, %v940_v52 }
 0x56e   :  { %v1113_v1 = vcombine.low %v1017_v28, %v1024_v53  ;;  %v2322_v54 = vcombine.high %v1017_v28, %v1024_v53  ;;  %v1129_v43 = vcombine.low %v1033_v55, %v1040_v62  ;;  %v2323_v44 = vcombine.high %v1033_v55, %v1040_v62 }
 0x56f   :  { %v949_v49 = vrot.slane %v941_v0, %v2989_v22  ;;  %v956_v3 = vrot.slane %v942_v2, %v2989_v22  ;;  %v965_v5 = vrot.slane %v957_v56, %v2989_v22  ;;  %v972_v6 = vrot.slane %v958_v57, %v2989_v22 }
 0x570   :  { %v1120_v7 = vrot.slane %v1113_v1, %v2985_v10  ;;  %v1128_v9 = vrot.slane %v2322_v54, %v2985_v10  ;;  %v1136_v12 = vrot.slane %v1129_v43, %v2985_v10  ;;  %v1144_v15 = vrot.slane %v2323_v44, %v2985_v10 }
 0x571   :  { %v1045_v41 = vcombine.low %v949_v49, %v956_v3  ;;  %v2320_v50 = vcombine.high %v949_v49, %v956_v3  ;;  %v1061_v60 = vcombine.low %v965_v5, %v972_v6  ;;  %v2321_v18 = vcombine.high %v965_v5, %v972_v6 }
 0x572   :  { %v1145_v20 = vcombine.low %v1120_v7, %v1128_v9  ;;  %v1161_v21 = vcombine.low %v1136_v12, %v1144_v15  ;;  %v1146_v47 = vcombine.high %v1120_v7, %v1128_v9  ;;  %v1162_v48 = vcombine.high %v1136_v12, %v1144_v15 }
 0x573   :  { %v1052_v23 = vrot.slane %v1045_v41, %v2985_v10  ;;  %v1060_v24 = vrot.slane %v2320_v50, %v2985_v10  ;;  %v1068_v25 = vrot.slane %v1061_v60, %v2985_v10  ;;  %v1076_v26 = vrot.slane %v2321_v18, %v2985_v10 }
 0x574   :  { %v1153_v27 = vrot.slane %v1145_v20, %v2989_v22  ;;  %v1169_v17 = vrot.slane %v1161_v21, %v2989_v22  ;;  %v1160_v62 = vrot.slane %v1146_v47, %v2989_v22  ;;  %v1176_v0 = vrot.slane %v1162_v48, %v2989_v22 }
 0x575   :  { %v1077_v13 = vcombine.low %v1052_v23, %v1060_v24  ;;  %v1093_v58 = vcombine.low %v1068_v25, %v1076_v26  ;;  %v1078_v45 = vcombine.high %v1052_v23, %v1060_v24  ;;  %v1094_v46 = vcombine.high %v1068_v25, %v1076_v26 }
 0x576   :  { %v1177_v31 = vcombine.low %v1153_v27, %v1169_v17  ;;  %v1178_v34 = vcombine.high %v1153_v27, %v1169_v17  ;;  %v1179_v44 = vcombine.low %v1160_v62, %v1176_v0  ;;  %v1180_v15 = vcombine.high %v1160_v62, %v1176_v0 }
 0x577   :  { %v1085_v63 = vrot.slane %v1077_v13, %v2989_v22  ;;  %v1101_v29 = vrot.slane %v1093_v58, %v2989_v22  ;;  %v1092_v51 = vrot.slane %v1078_v45, %v2989_v22  ;;  %v1108_v52 = vrot.slane %v1094_v46, %v2989_v22 }
 0x579   :  { %v1109_v30 = vcombine.low %v1085_v63, %v1101_v29  ;;  %v1110_v33 = vcombine.high %v1085_v63, %v1101_v29  ;;  %v1111_v56 = vcombine.low %v1092_v51, %v1108_v52  ;;  %v1112_v6 = vcombine.high %v1092_v51, %v1108_v52 }
 0x57b   :  { %v1181_v35 = vpack.c.bf16 %v1177_v31, %v1109_v30  ;;  %v1182_v36 = vpack.c.bf16 %v1178_v34, %v1110_v33  ;;  %v1183_v5 = vpack.c.bf16 %v1179_v44, %v1111_v56  ;;  %v1184_v41 = vpack.c.bf16 %v1180_v15, %v1112_v6 }
 0x57d   :  { %2409 = vmatpush3.bf16.msra.mxu1 %v1181_v35  ;;  %2415 = vmatpush3.bf16.msra.mxu0 %v1182_v36 }
 0x57e   :  { %2420 = vmatprep.subr.bf16.mxu1 %v2730_v59  ;;  %2426 = vmatprep.subr.bf16.mxu0 %v2730_v59 }
 0x59f   :  { %v1431_v37 = vpop.xlane.xlu0 %1430 }
 0x5a3   :  { %v1428_v38 = vpop.xlane.xlu0 %1427 }
 0x5a4   :  { %2541 = vrcp.f32 %v1428_v38 }
 0x5a6   :  { %v1425_v39 = vpop.xlane.xlu1 %1424 }
 0x5a7   :  { %2543 = vrcp.f32 %v1425_v39  ;;  %v1440_v40 = vpop.xlane.xlu0 %1439 }
 0x5a8   :  { %2545 = vrcp.f32 %v1431_v37 }
 0x5aa   :  { %v1434_v32 = vpop.xlane.xlu1 %1433 }
 0x5ab   :  { %2547 = vrcp.f32 %v1434_v32  ;;  %v1443_v28 = vpop.xlane.xlu0 %1442 }
 0x5ac   :  { %2549 = vrcp.f32 %v1440_v40 }
 0x5ae   :  { %v1437_v53 = vpop.xlane.xlu1 %1436  ;;  %v2542_v55 = vpop.eup %2541 }
 0x5af   :  { %2551 = vrcp.f32 %v1437_v53  ;;  %v1456_v57 = vmul.f32 %v2542_v55, %v3162_v8 }
 0x5b0   :  { %2553 = vrcp.f32 %v1443_v28 }
 0x5b1   :  { %v2544_v2 = vpop.eup %2543 }
 0x5b2   :  { %v1455_v1 = vmul.f32 %v2544_v2, %v3164_v11  ;;  %v1446_v54 = vpop.xlane.xlu1 %1445  ;;  %v2546_v43 = vpop.eup %2545 }
 0x5b3   :  { %2555 = vrcp.f32 %v1446_v54  ;;  %v1457_v7 = vmul.f32 %v2546_v43, %v3158_v4 }
 0x5b4   :  { %v1463_v49 = vpack.c.bf16 %v1456_v57, %v1455_v1 }
 0x5b5   :  { %v2548_v3 = vpop.eup %2547 }
 0x5b6   :  { %v1458_v9 = vmul.f32 %v2548_v3, %v3172_v16  ;;  %2411 = vmatmul.mubr.msk.bf16.vlgmr.msra.gmra.mrb[8].mxu1 %vm1374_vm3, %v1463_v49  ;;  %v2550_v12 = vpop.eup %2549 }
 0x5b7   :  { %2421 = vmatpush3.bf16.msra.mxu1 %v1183_v5  ;;  %2422 = vmatprep.mubr.msk.bf16.mxu1 %vm2731_vm1, %v2730_v59  ;;  %v1460_v50 = vmul.f32 %v2550_v12, %v3168_v14 }
 0x5b8   :  { %v1464_v8 = vpack.c.bf16 %v1458_v9, %v1457_v7  ;;  %2432 = vmatprep.subr.bf16.mxu1 %v2730_v59 }
 0x5b9   :  { %v2552_v11 = vpop.eup %2551 }
 0x5ba   :  { %v1459_v60 = vmul.f32 %v2552_v11, %v3180_v61  ;;  %2417 = vmatmul.mubr.msk.bf16.vlgmr.msra.gmra.mrb[12].mxu0 %vm1374_vm3, %v1464_v8  ;;  %v2554_v4 = vpop.eup %2553 }
 0x5bb   :  { %2427 = vmatpush3.bf16.msra.mxu0 %v1184_v41  ;;  %2428 = vmatprep.mubr.msk.bf16.mxu0 %vm2731_vm1, %v2730_v59  ;;  %v1461_v20 = vmul.f32 %v2554_v4, %v3176_v42 }
 0x5bc   :  { %v1465_v16 = vpack.c.bf16 %v1460_v50, %v1459_v60  ;;  %2440 = vmatprep.subr.bf16.mxu0 %v2730_v59 }
 0x5bd   :  { %v2556_v18 = vpop.eup %2555 }
 0x5be   :  { %v1462_v21 = vmul.f32 %v2556_v18, %v3186_v19  ;;  %2423 = vmatmul.mubr.msk.bf16.vlgmr.msra.gmra.mrb[12].mxu1 %vm1374_vm3, %v1465_v16 }
 0x5bf   :  { %2436 = vmatprep.mubr.msk.bf16.mxu1 %vm2731_vm1, %v2730_v59 }
 0x5c0   :  { %v1466_v14 = vpack.c.bf16 %v1462_v21, %v1461_v20 }
 0x5c2   :  { %2429 = vmatmul.mubr.msk.bf16.vlgmr.msra.gmra.mrb[16].mxu0 %vm1374_vm3, %v1466_v14 }
 0x5c3   :  { %2444 = vmatprep.mubr.msk.bf16.mxu0 %vm2731_vm1, %v2730_v59 }
 0x689   :  { %v1504_v61 = vpop.f32.mrb[8].mxu1 }
 0x68a   :  { %v2412_v23 = vpop.f32.mrb[9].mxu1 }
 0x68b   :  { %v1507_v24 = vpop.f32.mrb[10].mxu1 }
 0x68c   :  { %v2413_v25 = vpop.f32.mrb[11].mxu1 }
 0x68d   :  { %v1548_v26 = vpop.f32.mrb[12].mxu0  ;;  %v2511_v25 = vld [vmem:[#allocation8] sm:$0xff]  }
 0x68e   :  { %v2418_v13 = vpop.f32.mrb[13].mxu0  ;;  %2433 = vmatpush3.bf16.msra.mxu1 %v2511_v25 }
 0x68f   :  { %v1551_v42 = vpop.f32.mrb[14].mxu0  ;;  %2434 = vmatprep.subr.bf16.mxu1 %v2730_v59 }
 0x690   :  { %v2419_v58 = vpop.f32.mrb[15].mxu0 }
 0x691   :  { %v1592_v19 = vpop.f32.mrb[12].mxu1 }
 0x692   :  { %v1643_v27 = vcombine.low %v1504_v61, %v1592_v19  ;;  %v1644_v17 = vcombine.high %v1504_v61, %v1592_v19  ;;  %v2424_v63 = vpop.f32.mrb[13].mxu1 }
 0x693   :  { %v1595_v29 = vpop.f32.mrb[14].mxu1 }
 0x694   :  { %v1711_v30 = vcombine.low %v1507_v24, %v1595_v29  ;;  %v1712_v31 = vcombine.high %v1507_v24, %v1595_v29  ;;  %v2425_v33 = vpop.f32.mrb[15].mxu1  ;;  %v1651_v38 = vrot.slane %v1643_v27, %v2985_v10  ;;  %v1658_v39 = vrot.slane %v1644_v17, %v2985_v10 }
 0x695   :  { %v1636_v34 = vpop.f32.mrb[16].mxu0 }
 0x696   :  { %v1659_v35 = vcombine.low %v1548_v26, %v1636_v34  ;;  %v1660_v36 = vcombine.high %v1548_v26, %v1636_v34  ;;  %v2430_v37 = vpop.f32.mrb[17].mxu0  ;;  %v1719_v55 = vrot.slane %v1711_v30, %v2985_v10  ;;  %v1726_v62 = vrot.slane %v1712_v31, %v2985_v10 }
 0x697   :  { %v1639_v40 = vpop.f32.mrb[18].mxu0 }
 0x698   :  { %v1667_v45 = vrot.slane %v1659_v35, %v2985_v10  ;;  %v1674_v46 = vrot.slane %v1660_v36, %v2985_v10  ;;  %v1727_v32 = vcombine.low %v1551_v42, %v1639_v40  ;;  %v1728_v47 = vcombine.high %v1551_v42, %v1639_v40  ;;  %v2431_v48 = vpop.f32.mrb[19].mxu0 }
 0x69a   :  { %v1675_v51 = vcombine.low %v1651_v38, %v1667_v45  ;;  %v1676_v52 = vcombine.high %v1651_v38, %v1667_v45  ;;  %v1691_v28 = vcombine.low %v1658_v39, %v1674_v46  ;;  %v1692_v53 = vcombine.high %v1658_v39, %v1674_v46  ;;  %v2512_v45 = vld [vmem:[#allocation8 + $0x8] sm:$0xff]  }
 0x69b   :  { %v1735_v0 = vrot.slane %v1727_v32, %v2985_v10  ;;  %v1742_v2 = vrot.slane %v1728_v47, %v2985_v10  ;;  %2435 = vmatpush3.bf16.msra.mxu1 %v2512_v45 }
 0x69c   :  { %v1683_v56 = vrot.slane %v1675_v51, %v2989_v22  ;;  %v1690_v57 = vrot.slane %v1676_v52, %v2989_v22  ;;  %v1699_v1 = vrot.slane %v1691_v28, %v2989_v22  ;;  %v1706_v54 = vrot.slane %v1692_v53, %v2989_v22  ;;  %2448 = vmatprep.subr.bf16.mxu1 %v2730_v59 }
 0x69d   :  { %v1743_v43 = vcombine.low %v1719_v55, %v1735_v0  ;;  %v1744_v44 = vcombine.high %v1719_v55, %v1735_v0  ;;  %v1759_v49 = vcombine.low %v1726_v62, %v1742_v2  ;;  %v1760_v3 = vcombine.high %v1726_v62, %v1742_v2 }
 0x69e   :  { %v1779_v5 = vcombine.low %v1683_v56, %v1690_v57  ;;  %v2332_v6 = vcombine.high %v1683_v56, %v1690_v57  ;;  %v1795_v7 = vcombine.low %v1699_v1, %v1706_v54  ;;  %v2333_v9 = vcombine.high %v1699_v1, %v1706_v54 }
 0x69f   :  { %v1751_v12 = vrot.slane %v1743_v43, %v2989_v22  ;;  %v1758_v15 = vrot.slane %v1744_v44, %v2989_v22  ;;  %v1767_v8 = vrot.slane %v1759_v49, %v2989_v22  ;;  %v1774_v11 = vrot.slane %v1760_v3, %v2989_v22 }
 0x6a0   :  { %v1786_v41 = vrot.slane %v1779_v5, %v2985_v10  ;;  %v1794_v50 = vrot.slane %v2332_v6, %v2985_v10  ;;  %v1802_v60 = vrot.slane %v1795_v7, %v2985_v10  ;;  %v1810_v4 = vrot.slane %v2333_v9, %v2985_v10  ;;  %v2573_v9 = vld [vmem:[%s3361_s0] sm:$0xff] }
 0x6a1   :  { %v1847_v16 = vcombine.low %v1751_v12, %v1758_v15  ;;  %v2334_v18 = vcombine.high %v1751_v12, %v1758_v15  ;;  %v1863_v20 = vcombine.low %v1767_v8, %v1774_v11  ;;  %v2335_v21 = vcombine.high %v1767_v8, %v1774_v11  ;;  %v2574_v11 = vld [vmem:[%s3361_s0 + $0x8] sm:$0xff] }
 0x6a2   :  { %v1812_v14 = vcombine.high %v1786_v41, %v1794_v50  ;;  %v1828_v61 = vcombine.high %v1802_v60, %v1810_v4  ;;  %v1811_v23 = vcombine.low %v1786_v41, %v1794_v50  ;;  %v1827_v24 = vcombine.low %v1802_v60, %v1810_v4 }
 0x6a3   :  { %v1854_v26 = vrot.slane %v1847_v16, %v2985_v10  ;;  %v1862_v13 = vrot.slane %v2334_v18, %v2985_v10  ;;  %v1870_v42 = vrot.slane %v1863_v20, %v2985_v10  ;;  %v1878_v58 = vrot.slane %v2335_v21, %v2985_v10  ;;  %v2513_v20 = vld [vmem:[#allocation10] sm:$0xff]   ;;  %v2514_v21 = vld [vmem:[#allocation10 + $0x8] sm:$0xff]  }
 0x6a4   :  { %v1826_v19 = vrot.slane %v1812_v14, %v2989_v22  ;;  %v1842_v27 = vrot.slane %v1828_v61, %v2989_v22  ;;  %v1819_v17 = vrot.slane %v1811_v23, %v2989_v22  ;;  %v1835_v63 = vrot.slane %v1827_v24, %v2989_v22  ;;  %2441 = vmatpush3.bf16.msra.mxu0 %v2513_v20 }
 0x6a5   :  { %v1880_v29 = vcombine.high %v1854_v26, %v1862_v13  ;;  %v1896_v30 = vcombine.high %v1870_v42, %v1878_v58  ;;  %v1879_v31 = vcombine.low %v1854_v26, %v1862_v13  ;;  %v1895_v33 = vcombine.low %v1870_v42, %v1878_v58  ;;  %2442 = vmatprep.subr.bf16.mxu0 %v2730_v59 }
 0x6a6   :  { %v1845_v34 = vcombine.low %v1826_v19, %v1842_v27  ;;  %v1843_v35 = vcombine.low %v1819_v17, %v1835_v63  ;;  %v1844_v36 = vcombine.high %v1819_v17, %v1835_v63  ;;  %v1846_v37 = vcombine.high %v1826_v19, %v1842_v27  ;;  %v2339_v19 = vld [vmem:[%s3368_s7] ss:$0 sm:$0xff] }
 0x6a7   :  { %v1894_v10 = vrot.slane %v1880_v29, %v2989_v22  ;;  %v1910_v38 = vrot.slane %v1896_v30, %v2989_v22  ;;  %v1887_v39 = vrot.slane %v1879_v31, %v2989_v22  ;;  %v1903_v40 = vrot.slane %v1895_v33, %v2989_v22  ;;  %v2515_v30 = vld [vmem:[%s3370_s9] sm:$0xff]   ;;  %v2516_v31 = vld [vmem:[%s3370_s9 + $0x8] sm:$0xff]   ;;  %v2517_v33 = vld [vmem:[%s3370_s9 + $0x10] sm:$0xff]  }
 0x6a8   :  { %2443 = vmatpush3.bf16.msra.mxu0 %v2514_v21 }
 0x6a9   :  { %v1913_v46 = vcombine.low %v1894_v10, %v1910_v38  ;;  %v1912_v32 = vcombine.high %v1887_v39, %v1903_v40  ;;  %v1911_v47 = vcombine.low %v1887_v39, %v1903_v40  ;;  %v1914_v48 = vcombine.high %v1894_v10, %v1910_v38  ;;  %2460 = vmatprep.subr.bf16.mxu0 %v2730_v59 }
 0x6ab   :  { %v2495_v51 = vpack.i.bf16 %v1913_v46, %v1845_v34  ;;  %v2490_v52 = vpack.i.bf16 %v1912_v32, %v1844_v36  ;;  %v2500_v28 = vpack.i.bf16 %v1914_v48, %v1846_v37  ;;  %v2518_v34 = vld [vmem:[%s3370_s9 + $0x18] sm:$0xff]  }
 0x6ad   :  { %2496 = vrot.lane.b32.xlu1 %v2495_v51, %s2734_s17  ;;  %2491 = vrot.lane.b32.xlu0 %v2490_v52, %s2718_s16 }
 0x6b1   :  { %2501 = vrot.lane.b32.xlu1 %v2500_v28, %s2735_s3 }
 0x71f   :  { %v2497_v53 = vpop.permute.xlu1 %2496  ;;  %v2492_v55 = vpop.permute.xlu0 %2491 }
 0x720   :  { %v2494_v22 = vunpack.i.h.bf16 %v2492_v55  ;;  %v2493_v62 = vunpack.i.l.bf16 %v2492_v55  ;;  %v2499_v0 = vunpack.i.h.bf16 %v2497_v53  ;;  %v2498_v2 = vunpack.i.l.bf16 %v2497_v53 }
 0x722   :  { %v1939_v56 = vsel %vm1185_vm2, %v1843_v35, %v2493_v62  ;;  %v1940_v57 = vsel %vm1185_vm2, %v1911_v47, %v2494_v22 }
 0x723   :  { %v2502_v1 = vpop.permute.xlu1 %2501  ;;  %v1941_v44 = vsel %vm1374_vm3, %v1939_v56, %v2498_v2  ;;  %v1942_v49 = vsel %vm1374_vm3, %v1940_v57, %v2499_v0 }
 0x724   :  { %v2504_v54 = vunpack.i.h.bf16 %v2502_v1  ;;  %v2503_v43 = vunpack.i.l.bf16 %v2502_v1 }
 0x726   :  { %v1944_v3 = vsel %vm1943_vm4, %v1941_v44, %v2503_v43  ;;  %v1945_v5 = vsel %vm1943_vm4, %v1942_v49, %v2504_v54 }
 0x727   :  { %v1946_v6 = vpack.c.bf16 %v1945_v5, %v1944_v3  ;;  %v2519_v5 = vld [vmem:[%s3372_s11] sm:$0xff]  }
 0x729   :  { %2437 = vmatmul.mubr.msk.bf16.vlgmr.msra.gmra.mrb[16].mxu1 %vm122_vm0, %v1946_v6  ;;  %v2520_v6 = vld [vmem:[%s3372_s11 + $0x8] sm:$0xff]   ;;  %s2736_s11 = smov [#allocation11]  }
 0x72a   :  { %2456 = vmatprep.mubr.msk.bf16.mxu1 %vm2731_vm1, %v2730_v59  ;;  %2449 = vmatpush3.bf16.msra.mxu1 %v2515_v30  ;;  %s2292_s4 = sshll.u32 %s2736_s11, 4  ;;  %s2293_s4 = int_to_ptr.vmem [resolvable:$true] %s2292_s4 }
 0x72b   :  { %2450 = vmatprep.subr.bf16.mxu1 %v2730_v59  ;;  %s2685_s29 = scalar_lea.vmem %s2293_s4, 256  ;;  %p2690_p13 = scmp.lt.s32.totalorder %s2293_s4, %s2293_s4 }
 0x72c   :  { %p2686_p12 = scmp.ne.s32.totalorder %s2293_s4, %s2685_s29  ;;  %p2691_p0 = scmp.lt.s32.totalorder %s2685_s29, %s2685_s29 }
 0x72e   :  { %2451 = vmatpush3.bf16.msra.mxu1 %v2516_v31  ;;  %p2692_p1 = por %p2691_p0, %p2690_p13 }
 0x72f   :  { %2452 = vmatprep.subr.bf16.mxu1 %v2730_v59 }
 0x730   :  { %p2693_p2 = pnand %p2692_p1, %p2686_p12 }
 0x732   :  { %2453 = vmatpush3.bf16.msra.mxu1 %v2517_v33 }
 0x733   :  { %2454 = vmatprep.subr.bf16.mxu1 %v2730_v59 }
 0x736   :  { %2455 = vmatpush3.bf16.msra.mxu1 %v2518_v34 }
 0x7fc   :  { %v2000_v7 = vpop.f32.mrb[16].mxu1 }
 0x7fd   :  { %v3291_v12 = vadd.f32 %v2573_v9, %v2000_v7  ;;  %v2438_v15 = vpop.f32.mrb[17].mxu1 }
 0x7fe   :  { %v2003_v8 = vpop.f32.mrb[18].mxu1 }
 0x7ff   :  { %v3296_v41 = vadd.f32 %v2574_v11, %v2003_v8  ;;  %v2439_v50 = vpop.f32.mrb[19].mxu1  ;;  %v2010_v60 = vmul.f32 %v3291_v12, %v3291_v12 }
 0x801   :  { %v2012_v4 = vsel %vm122_vm0, %v2010_v60, 0.0  ;;  %v2011_v16 = vmul.f32 %v3296_v41, %v3296_v41 }
 0x802   :  { %2013 = vadd.xlane.f32.xlu0 %v2012_v4  ;;  %v2350_v4 = vld [vmem:[%s3371_s10] ss:$0 sm:$0xff] }
 0x803   :  { %v2015_v18 = vsel %vm122_vm0, %v2011_v16, 0.0 }
 0x804   :  { %2016 = vadd.xlane.f32.xlu1 %v2015_v18 }
 0x88f   :  { %v2014_v14 = vpop.xlane.xlu0 %2013 }
 0x890   :  { %v2018_v61 = vmul.f32 0.03125, %v2014_v14 }
 0x891   :  { %v2017_v23 = vpop.xlane.xlu1 %2016 }
 0x892   :  { %v2020_v24 = vadd.f32 1e-05, %v2018_v61  ;;  %v2019_v25 = vmul.f32 0.03125, %v2017_v23 }
 0x894   :  { %2557 = vrsqrt.f32 %v2020_v24  ;;  %v2021_v26 = vadd.f32 1e-05, %v2019_v25 }
 0x896   :  { %2559 = vrsqrt.f32 %v2021_v26 }
 0x89e   :  { %v2558_v13 = vpop.eup %2557 }
 0x89f   :  { %v2024_v42 = vmul.f32 %v2558_v13, %v3291_v12 }
 0x8a0   :  { %v2560_v58 = vpop.eup %2559 }
 0x8a1   :  { %v2025_v27 = vmul.f32 %v2560_v58, %v3296_v41  ;;  %v2032_v17 = vmul.f32 %v2339_v19, %v2024_v42 }
 0x8a3   :  { %v2033_v63 = vmul.f32 %v2339_v19, %v2025_v27 }
 0x8a5   :  { %v2034_v29 = vpack.c.bf16 %v2033_v63, %v2032_v17 }
 0x8a7   :  { %2445 = vmatmul.mubr.msk.bf16.vlgmr.msra.gmra.mrb[20].mxu0 %vm122_vm0, %v2034_v29 }
 0x8a8   :  { %2464 = vmatprep.mubr.msk.bf16.mxu0 %vm2731_vm1, %v2730_v59  ;;  %2461 = vmatpush3.bf16.msra.mxu0 %v2519_v5 }
 0x8a9   :  { %2462 = vmatprep.subr.bf16.mxu0 %v2730_v59 }
 0x8ac   :  { %2463 = vmatpush3.bf16.msra.mxu0 %v2520_v6 }
 0x97a   :  { %v2088_v35 = vpop.f32.mrb[20].mxu0 }
 0x97b   :  { %2111 = vrot.lane.b32.xlu0 %v2088_v35, %s2719_s2  ;;  %v2446_v36 = vpop.f32.mrb[21].mxu0  ;;  %v2343_v38 = vmul.f32 -1.442695, %v2088_v35 }
 0x97c   :  { %v2091_v37 = vpop.f32.mrb[22].mxu0 }
 0x97d   :  { %2113 = vrot.lane.b32.xlu1 %v2091_v37, %s2719_s2  ;;  %v2447_v10 = vpop.f32.mrb[23].mxu0  ;;  %v2344_v39 = vmul.f32 -1.442695, %v2091_v37  ;;  %2561 = vpow2.f32 %v2343_v38 }
 0x97f   :  { %2563 = vpow2.f32 %v2344_v39 }
 0x987   :  { %v2562_v40 = vpop.eup %2561 }
 0x988   :  { %v2101_v46 = vadd.f32 1.0, %v2562_v40 }
 0x989   :  { %v2564_v45 = vpop.eup %2563 }
 0x98a   :  { %v2102_v32 = vadd.f32 1.0, %v2564_v45  ;;  %2565 = vrcp.f32 %v2101_v46 }
 0x98c   :  { %2567 = vrcp.f32 %v2102_v32 }
 0x994   :  { %v2566_v47 = vpop.eup %2565 }
 0x995   :  { %v2107_v52 = vmul.f32 %v2566_v47, %v2088_v35 }
 0x996   :  { %v2568_v48 = vpop.eup %2567 }
 0x997   :  { %v2108_v28 = vmul.f32 %v2568_v48, %v2091_v37 }
 0x9ed   :  { %v2112_v51 = vpop.permute.xlu0 %2111 }
 0x9ee   :  { %v2117_v55 = vmul.f32 %v2112_v51, %v2107_v52 }
 0x9ef   :  { %v2114_v53 = vpop.permute.xlu1 %2113 }
 0x9f0   :  { %v2118_v22 = vmul.f32 %v2114_v53, %v2108_v28 }
 0x9f2   :  { %v2119_v62 = vpack.c.bf16 %v2118_v22, %v2117_v55 }
 0x9f4   :  { %2457 = vmatmul.mubr.msk.bf16.vlgmr.msra.gmra.mrb[20].mxu1 %vm2152_vm5, %v2119_v62 }
 0xac7   :  { %v2190_v0 = vpop.f32.mrb[20].mxu1 }
 0xac8   :  { %v2197_v2 = vadd.f32 %v2190_v0, %v3291_v12  ;;  %v2458_v56 = vpop.f32.mrb[21].mxu1 }
 0xac9   :  { %v2193_v57 = vpop.f32.mrb[22].mxu1 }
 0xaca   :  { %v2198_v1 = vadd.f32 %v2193_v57, %v3296_v41  ;;  %v2459_v54 = vpop.f32.mrb[23].mxu1  ;;  %v2200_v43 = vmul.f32 %v2197_v2, %v2197_v2 }
 0xacc   :  { %v2202_v44 = vsel %vm122_vm0, %v2200_v43, 0.0  ;;  %v2201_v49 = vmul.f32 %v2198_v1, %v2198_v1 }
 0xacd   :  { %2203 = vadd.xlane.f32.xlu0 %v2202_v44 }
 0xace   :  { %v2205_v3 = vsel %vm122_vm0, %v2201_v49, 0.0 }
 0xacf   :  { %2206 = vadd.xlane.f32.xlu1 %v2205_v3 }
 0xb5a   :  { %v2204_v7 = vpop.xlane.xlu0 %2203 }
 0xb5b   :  { %v2208_v9 = vmul.f32 0.03125, %v2204_v7 }
 0xb5c   :  { %v2207_v12 = vpop.xlane.xlu1 %2206 }
 0xb5d   :  { %v2210_v15 = vadd.f32 1e-05, %v2208_v9  ;;  %v2209_v8 = vmul.f32 0.03125, %v2207_v12 }
 0xb5f   :  { %2569 = vrsqrt.f32 %v2210_v15  ;;  %v2211_v11 = vadd.f32 1e-05, %v2209_v8 }
 0xb61   :  { %2571 = vrsqrt.f32 %v2211_v11 }
 0xb69   :  { %v2570_v41 = vpop.eup %2569 }
 0xb6a   :  { %v2214_v50 = vmul.f32 %v2570_v41, %v2197_v2 }
 0xb6b   :  { %v2572_v60 = vpop.eup %2571 }
 0xb6c   :  { %v2215_v16 = vmul.f32 %v2572_v60, %v2198_v1  ;;  %v2222_v18 = vmul.f32 %v2350_v4, %v2214_v50 }
 0xb6e   :  { %v2223_v20 = vmul.f32 %v2350_v4, %v2215_v16 }
 0xb70   :  { %v2224_v59 = vpack.c.bf16 %v2223_v20, %v2222_v18 }
 0xb72   :  { %2465 = vmatmul.mubr.msk.bf16.vlgmr.msra.gmra.mrb[24].mxu0 %vm122_vm0, %v2224_v59 }
 0xc45   :  { %v2278_v21 = vpop.f32.mrb[24].mxu0 }
 0xc46   :  { %2285 = vst [vmem:[#allocation11] sm:$0xff] %v2278_v21  ;;  %v2466_v14 = vpop.f32.mrb[25].mxu0 }
 0xc47   :  { %v2281_v61 = vpop.f32.mrb[26].mxu0 }
 0xc48   :  { %2286 = vst [vmem:[#allocation11 + $0x8] sm:$0xff] %v2281_v61  ;;  %v2467_v23 = vpop.f32.mrb[27].mxu0 }
 0xc49   :  { %2696 = shalt.err (!%p2693_p2)
}
 0xc4a   :  { %s2697_s13 = scalar_lea.hbm %s3373_s12, 256 }
 0xc4b   :  { %p2698_p3 = scmp.ne.s32.totalorder %s3373_s12, %s2697_s13  ;;  %p2701_p4 = scmp.lt.u32.totalorder %s2697_s13, %s3373_s12 }
 0xc4d   :  { %p2703_p5 = pnand %p2701_p4, %p2698_p3 }
 0xc4f   :  { %2706 = shalt.err (!%p2703_p5)
}
 0xc50   :  { %2298 = dma.vmem_to_hbm [thread:$0]  %s2293_s4, 256, %s3373_s12, [#allocation4], %s2717_s15, %s2717_s15, %s2718_s16  }
 0xc51   :  { %2713 = dma.done.wait [#allocation4], 256  }
 0xc52   :  { %2714 = vsyncadd [#allocation4], 4294967040 }
 0xc53   :  { %2302 = vsyncpa [#allocation3], 1 }
 0xc54   :  { %2303 = vsyncpa [#allocation6], 1 }
 0xc55   :  { %2304 = vsyncpa [#allocation9], 1 }
 0xc56   :  { %2305 = vsyncpa [#allocation4], 1 }

</bundles_post_ra>
